<compile_context>
chip_gen: v7x
topology: tpu7x:2x2x1
jax: 0.10.0
libtpu: 0.0.40
codegen_flags: <defaults>
</compile_context>

<pallas_src>
import functools

import jax
import jax.numpy as jnp
import numpy as np
from jax.experimental import pallas as pl
from jax.experimental.pallas import tpu as pltpu

jax.config.update("jax_default_matmul_precision", "highest")


# ----------------------------------------------------------------------------
# helpers
# ----------------------------------------------------------------------------
def _choose_tile(n, target, prefer_multiple=None):
    """Largest divisor of n that is <= target (preferring multiples of
    `prefer_multiple` when possible)."""
    if n <= target:
        return n
    best = 1
    for t in range(target, 0, -1):
        if n % t == 0:
            if prefer_multiple is None:
                return t
            if t % prefer_multiple == 0:
                return t
            if best == 1:
                best = t
    return best


def _vmem_limit(block_shapes, dtype_bytes=4):
    """Explicit scoped-VMEM limit: double-buffered blocks + slack, clamped so
    it stays safe on v7x (64 MiB physical)."""
    need = 2 * sum(int(np.prod(s)) for s in block_shapes) * dtype_bytes
    need += 4 << 20
    return int(min(max(need, 16 << 20), 56 << 20))


# ----------------------------------------------------------------------------
# Pallas kernels
# ----------------------------------------------------------------------------
def _mha_ln_kernel(x_ref, wqkv_ref, bqkv_ref, wo_ref, bo_ref, g_ref, b_ref,
                   o_ref, oh_ref, *, num_heads):
    """One batch element: h1 = LayerNorm(x + MHA(x)).  x block: (1, S, D)."""
    S, D = x_ref.shape[1], x_ref.shape[2]
    Dh = D // num_heads
    scale = 1.0 / (Dh ** 0.5)

    xb = x_ref[0]                                                     # (S, D)
    qkv = jnp.dot(xb, wqkv_ref[...],
                  preferred_element_type=jnp.float32) + bqkv_ref[...]
    q = qkv[:, :D]
    k = qkv[:, D:2 * D]
    v = qkv[:, 2 * D:]

    for h in range(num_heads):
        sl = slice(h * Dh, (h + 1) * Dh)
        s = jax.lax.dot_general(q[:, sl] * scale, k[:, sl],
                                (((1,), (1,)), ((), ())),
                                preferred_element_type=jnp.float32)   # (S, S)
        m = jnp.max(s, axis=-1, keepdims=True)
        e = jnp.exp(s - m)
        p = e * pl.reciprocal(jnp.sum(e, axis=-1, keepdims=True), approx=False)
        oh_ref[:, sl] = jnp.dot(p, v[:, sl],
                                preferred_element_type=jnp.float32)   # (S, Dh)

    # Single full-D output projection (one MXU matmul instead of per-head).
    attn = jnp.dot(oh_ref[...], wo_ref[...],
                   preferred_element_type=jnp.float32) + bo_ref[...]

    # Fused residual + LayerNorm (eps = 1e-5, PyTorch default).
    z = xb + attn
    mu = jnp.mean(z, axis=-1, keepdims=True)
    zc = z - mu
    var = jnp.mean(zc * zc, axis=-1, keepdims=True)
    o_ref[0] = zc * jax.lax.rsqrt(var + 1e-5) * g_ref[...] + b_ref[...]


def _moe_ln_kernel(x_ref, gw_ref, gb_ref, w1_ref, b1_ref, w2_ref, b2_ref,
                   g_ref, b_ref, o_ref, probs_ref, acc_ref, *,
                   num_experts, threshold):
    """Grid = (row_tiles, experts).  Per expert k: acc += probs_k * expert_k(x).
    Gating probs computed once at k==0; LN(x + acc) emitted at k==K-1."""
    k = pl.program_id(1)
    x = x_ref[...]                                                    # (T, D)

    @pl.when(k == 0)
    def _():
        logits = jnp.dot(x, gw_ref[...],
                         preferred_element_type=jnp.float32) + gb_ref[...]
        m = jnp.max(logits, axis=-1, keepdims=True)
        e = jnp.exp(logits - m)
        probs = e * pl.reciprocal(jnp.sum(e, axis=-1, keepdims=True),
                                  approx=False)
        # DenseMoE, gating_type == 'softmax', threshold < 1.0 branch:
        mask = (probs > threshold).astype(jnp.float32)
        sum_mask = jnp.sum(mask, axis=-1, keepdims=True)
        mask = jnp.where(sum_mask == 0.0,
                         jnp.full_like(mask, 1.0 / num_experts), mask)
        probs_ref[...] = mask * pl.reciprocal(
            jnp.sum(mask, axis=-1, keepdims=True), approx=False)
        acc_ref[...] = jnp.zeros_like(acc_ref)

    # Current expert's FFN (only this expert's weights are resident in VMEM).
    h = jnp.maximum(
        jnp.dot(x, w1_ref[0], preferred_element_type=jnp.float32) + b1_ref[0],
        0.0)
    o = jnp.dot(h, w2_ref[0], preferred_element_type=jnp.float32) + b2_ref[0]

    # Select gating weight for expert k without dynamic lane indexing.
    lane = jax.lax.broadcasted_iota(jnp.int32, probs_ref.shape, 1)
    wk = jnp.sum(jnp.where(lane == k, probs_ref[...], 0.0),
                 axis=-1, keepdims=True)                              # (T, 1)
    acc_ref[...] = acc_ref[...] + wk * o

    @pl.when(k == num_experts - 1)
    def _():
        z = x + acc_ref[...]
        mu = jnp.mean(z, axis=-1, keepdims=True)
        zc = z - mu
        var = jnp.mean(zc * zc, axis=-1, keepdims=True)
        o_ref[...] = zc * jax.lax.rsqrt(var + 1e-5) * g_ref[...] + b_ref[...]


def _ln_kernel(x_ref, g_ref, b_ref, o_ref):
    """Plain LayerNorm over the last dim (eps = 1e-5)."""
    z = x_ref[...]
    mu = jnp.mean(z, axis=-1, keepdims=True)
    zc = z - mu
    var = jnp.mean(zc * zc, axis=-1, keepdims=True)
    o_ref[...] = zc * jax.lax.rsqrt(var + 1e-5) * g_ref[...] + b_ref[...]


def _linear_kernel(x_ref, w_ref, b_ref, o_ref):
    o_ref[...] = (jnp.dot(x_ref[...], w_ref[...],
                          preferred_element_type=jnp.float32) + b_ref[...])


# ----------------------------------------------------------------------------
# Pallas wrappers
# ----------------------------------------------------------------------------
def mha_ln_pallas(x, wqkv_t, bqkv, wo_t, bo, gamma, beta, *, num_heads):
    B, S, D = x.shape
    kernel = functools.partial(_mha_ln_kernel, num_heads=num_heads)
    blocks = [(1, S, D), (D, 3 * D), (1, 3 * D), (D, D), (1, D), (1, D),
              (1, D), (1, S, D), (S, D), (S, 3 * D)]
    return pl.pallas_call(
        kernel,
        out_shape=jax.ShapeDtypeStruct((B, S, D), jnp.float32),
        grid=(B,),
        in_specs=[
            pl.BlockSpec((1, S, D), lambda b: (b, 0, 0)),
            pl.BlockSpec((D, 3 * D), lambda b: (0, 0)),
            pl.BlockSpec((1, 3 * D), lambda b: (0, 0)),
            pl.BlockSpec((D, D), lambda b: (0, 0)),
            pl.BlockSpec((1, D), lambda b: (0, 0)),
            pl.BlockSpec((1, D), lambda b: (0, 0)),
            pl.BlockSpec((1, D), lambda b: (0, 0)),
        ],
        out_specs=pl.BlockSpec((1, S, D), lambda b: (b, 0, 0)),
        scratch_shapes=[pltpu.VMEM((S, D), jnp.float32)],
        compiler_params=pltpu.CompilerParams(
            dimension_semantics=("parallel",),
            vmem_limit_bytes=_vmem_limit(blocks)),
    )(x, wqkv_t, bqkv, wo_t, bo, gamma, beta)


def moe_ln_pallas(x, gw_t, gb, w1_t, b1, w2_t, b2, gamma, beta, *,
                  num_experts, threshold, row_tile=256):
    N, D = x.shape
    H = w1_t.shape[2]          # 4 * D
    tn = _choose_tile(N, row_tile)
    kernel = functools.partial(_moe_ln_kernel, num_experts=num_experts,
                               threshold=threshold)
    blocks = [(tn, D), (D, num_experts), (1, num_experts),
              (1, D, H), (1, 1, H), (1, H, D), (1, 1, D),
              (1, D), (1, D), (tn, D), (tn, num_experts), (tn, D)]
    return pl.pallas_call(
        kernel,
        out_shape=jax.ShapeDtypeStruct((N, D), jnp.float32),
        grid=(N // tn, num_experts),
        in_specs=[
            pl.BlockSpec((tn, D), lambda i, k: (i, 0)),
            pl.BlockSpec((D, num_experts), lambda i, k: (0, 0)),
            pl.BlockSpec((1, num_experts), lambda i, k: (0, 0)),
            pl.BlockSpec((1, D, H), lambda i, k: (k, 0, 0)),
            pl.BlockSpec((1, 1, H), lambda i, k: (k, 0, 0)),
            pl.BlockSpec((1, H, D), lambda i, k: (k, 0, 0)),
            pl.BlockSpec((1, 1, D), lambda i, k: (k, 0, 0)),
            pl.BlockSpec((1, D), lambda i, k: (0, 0)),
            pl.BlockSpec((1, D), lambda i, k: (0, 0)),
        ],
        out_specs=pl.BlockSpec((tn, D), lambda i, k: (i, 0)),
        scratch_shapes=[pltpu.VMEM((tn, num_experts), jnp.float32),
                        pltpu.VMEM((tn, D), jnp.float32)],
        compiler_params=pltpu.CompilerParams(
            dimension_semantics=("parallel", "arbitrary"),
            vmem_limit_bytes=_vmem_limit(blocks)),
    )(x, gw_t, gb, w1_t, b1, w2_t, b2, gamma, beta)


def ln_pallas(x, gamma, beta, row_tile=512):
    N, D = x.shape
    tn = _choose_tile(N, row_tile)
    return pl.pallas_call(
        _ln_kernel,
        out_shape=jax.ShapeDtypeStruct((N, D), jnp.float32),
        grid=(N // tn,),
        in_specs=[
            pl.BlockSpec((tn, D), lambda i: (i, 0)),
            pl.BlockSpec((1, D), lambda i: (0, 0)),
            pl.BlockSpec((1, D), lambda i: (0, 0)),
        ],
        out_specs=pl.BlockSpec((tn, D), lambda i: (i, 0)),
        compiler_params=pltpu.CompilerParams(
            dimension_semantics=("parallel",)),
    )(x, gamma, beta)


def head_pallas(x, w_t, b, row_tile=256, vocab_tile=2048):
    N, D = x.shape
    V = w_t.shape[1]
    tn = _choose_tile(N, row_tile)
    tv = _choose_tile(V, vocab_tile, prefer_multiple=128)
    blocks = [(tn, D), (D, tv), (1, tv), (tn, tv)]
    return pl.pallas_call(
        _linear_kernel,
        out_shape=jax.ShapeDtypeStruct((N, V), jnp.float32),
        grid=(N // tn, V // tv),
        in_specs=[
            pl.BlockSpec((tn, D), lambda i, j: (i, 0)),
            pl.BlockSpec((D, tv), lambda i, j: (0, j)),
            pl.BlockSpec((1, tv), lambda i, j: (0, j)),
        ],
        out_specs=pl.BlockSpec((tn, tv), lambda i, j: (i, j)),
        compiler_params=pltpu.CompilerParams(
            dimension_semantics=("parallel", "parallel"),
            vmem_limit_bytes=_vmem_limit(blocks)),
    )(x, w_t, b)


# ----------------------------------------------------------------------------
# Parameters (deterministic, in-script init, stored pre-transposed)
# ----------------------------------------------------------------------------
def init_params(key, d_model, n_layers, num_experts, vocab):
    keys = iter(jax.random.split(key, 1024))
    D = d_model

    def nrm(shape, scale=0.02):
        return (scale * jax.random.normal(next(keys), shape)).astype(jnp.float32)

    p = {
        "embed": nrm((vocab, D)),
        "pos": jnp.zeros((1, 1024, D), jnp.float32),     # nn.Parameter(zeros)
        "head_w_t": nrm((D, vocab)),                      # stored as x @ W_t
        "head_b": nrm((1, vocab)),
        "lnf_g": jnp.ones((1, D), jnp.float32),
        "lnf_b": jnp.zeros((1, D), jnp.float32),
    }
    blocks = []
    for _ in range(n_layers):
        blk = {
            "wqkv_t": nrm((D, 3 * D)),
            "bqkv": nrm((1, 3 * D)),
            "wo_t": nrm((D, D)),
            "bo": nrm((1, D)),
            "gate_w_t": nrm((D, num_experts)),
            "gate_b": nrm((1, num_experts)),
            "w1_t": nrm((num_experts, D, 4 * D)),
            "b1": nrm((num_experts, 1, 4 * D)),
            "w2_t": nrm((num_experts, 4 * D, D)),
            "b2": nrm((num_experts, 1, D)),
            "ln1_g": jnp.ones((1, D), jnp.float32),
            "ln1_b": jnp.zeros((1, D), jnp.float32),
            "ln2_g": jnp.ones((1, D), jnp.float32),
            "ln2_b": jnp.zeros((1, D), jnp.float32),
        }
        blocks.append(blk)
    p["blocks"] = blocks
    return p


# ----------------------------------------------------------------------------
# Full forward (Pallas)
# ----------------------------------------------------------------------------
def forward_pallas(tokens, p, *, num_heads, num_experts, threshold=0.5):
    B, S = tokens.shape
    D = p["embed"].shape[1]
    N = B * S
    # Embedding gather + positional embedding: plain-JAX glue.
    hidden = (p["embed"][tokens] + p["pos"][:, :S, :]).astype(jnp.float32)
    for blk in p["blocks"]:
        # h1 = LN(x + MHA(x))  -- fused, one pallas_call, grid over batch.
        h1 = mha_ln_pallas(hidden, blk["wqkv_t"], blk["bqkv"],
                           blk["wo_t"], blk["bo"],
                           blk["ln1_g"], blk["ln1_b"], num_heads=num_heads)
        # h2 = LN(h1 + MoE(h1)) -- fused, expert index is an inner grid axis.
        h2 = moe_ln_pallas(h1.reshape(N, D), blk["gate_w_t"], blk["gate_b"],
                           blk["w1_t"], blk["b1"], blk["w2_t"], blk["b2"],
                           blk["ln2_g"], blk["ln2_b"],
                           num_experts=num_experts, threshold=threshold)
        hidden = h2.reshape(B, S, D)
    hf = ln_pallas(hidden.reshape(N, D), p["lnf_g"], p["lnf_b"])
    logits = head_pallas(hf, p["head_w_t"], p["head_b"])
    return logits.reshape(B, S, -1)


# ----------------------------------------------------------------------------
# Pure-JAX reference (for numerical validation)
# ----------------------------------------------------------------------------
def forward_reference(tokens, p, *, num_heads, num_experts, threshold=0.5):
    B, S = tokens.shape
    D = p["embed"].shape[1]
    Dh = D // num_heads

    def ln(z, g, b):
        mu = z.mean(-1, keepdims=True)
        var = ((z - mu) ** 2).mean(-1, keepdims=True)
        return (z - mu) / jnp.sqrt(var + 1e-5) * g + b

    h = (p["embed"][tokens] + p["pos"][:, :S, :]).astype(jnp.float32)
    for blk in p["blocks"]:
        qkv = h @ blk["wqkv_t"] + blk["bqkv"]
        q, k, v = jnp.split(qkv, 3, axis=-1)
        q = q.reshape(B, S, num_heads, Dh).transpose(0, 2, 1, 3)
        k = k.reshape(B, S, num_heads, Dh).transpose(0, 2, 1, 3)
        v = v.reshape(B, S, num_heads, Dh).transpose(0, 2, 1, 3)
        s = jnp.einsum("bhqd,bhkd->bhqk", q, k) / (Dh ** 0.5)
        pw = jax.nn.softmax(s, axis=-1)
        ao = jnp.einsum("bhqk,bhkd->bhqd", pw, v).transpose(0, 2, 1, 3)
        ao = ao.reshape(B, S, D) @ blk["wo_t"] + blk["bo"]
        h = ln(h + ao, blk["ln1_g"], blk["ln1_b"])

        logits = h @ blk["gate_w_t"] + blk["gate_b"]
        probs = jax.nn.softmax(logits, axis=-1)
        mask = (probs > threshold).astype(jnp.float32)
        sm = mask.sum(-1, keepdims=True)
        mask = jnp.where(sm == 0.0, jnp.full_like(mask, 1.0 / num_experts), mask)
        probs = mask / mask.sum(-1, keepdims=True)
        moe = jnp.zeros_like(h)
        for e_ in range(num_experts):
            t = jnp.maximum(h @ blk["w1_t"][e_] + blk["b1"][e_], 0.0)
            o = t @ blk["w2_t"][e_] + blk["b2"][e_]
            moe = moe + probs[..., e_:e_ + 1] * o
        h = ln(h + moe, blk["ln2_g"], blk["ln2_b"])
    h = ln(h, p["lnf_g"], p["lnf_b"])
    return h @ p["head_w_t"] + p["head_b"]


# ----------------------------------------------------------------------------
if __name__ == "__main__":
    D_MODEL, N_LAYERS, NUM_HEADS, NUM_EXPERTS, VOCAB = 32, 2, 4, 4, 64
    BATCH, SEQ = 2, 8

    root = jax.random.PRNGKey(0)
    k_param, k_tok = jax.random.split(root)
    params = init_params(k_param, D_MODEL, N_LAYERS, NUM_EXPERTS, VOCAB)
    tokens = jax.random.randint(k_tok, (BATCH, SEQ), 0, VOCAB, dtype=jnp.int32)

    logits = forward_pallas(tokens, params, num_heads=NUM_HEADS,
                            num_experts=NUM_EXPERTS, threshold=0.5)
    logits = jax.block_until_ready(logits)

    ref = forward_reference(tokens, params, num_heads=NUM_HEADS,
                            num_experts=NUM_EXPERTS, threshold=0.5)
    ref = jax.block_until_ready(ref)

    assert logits.shape == (BATCH, SEQ, VOCAB)
    np.testing.assert_allclose(np.asarray(logits), np.asarray(ref),
                               rtol=5e-3, atol=5e-3)
    print("KERNEL_OK")
</pallas_src>

<mosaic_0001>
module attributes {stable_mosaic.version = 11 : i64} {
  func.func @_mha_ln_kernel(%arg0: i32, %arg1: memref<1x8x32xf32, #tpu.memory_space<vmem>>, %arg2: memref<32x96xf32, #tpu.memory_space<vmem>>, %arg3: memref<1x96xf32, #tpu.memory_space<vmem>>, %arg4: memref<32x32xf32, #tpu.memory_space<vmem>>, %arg5: memref<1x32xf32, #tpu.memory_space<vmem>>, %arg6: memref<1x32xf32, #tpu.memory_space<vmem>>, %arg7: memref<1x32xf32, #tpu.memory_space<vmem>>, %arg8: memref<1x8x32xf32, #tpu.memory_space<vmem>>, %arg9: memref<8x32xf32, #tpu.memory_space<vmem>>) attributes {dimension_semantics = [#tpu.dimension_semantics<parallel>], iteration_bounds = array<i64: 2>, scalar_prefetch = 0 : i64, scratch_operands = 1 : i64, tpu.core_type = #tpu.core_type<tc>, window_params = [{transform_indices = @transform_0, window_bounds = array<i64: 1, 8, 32>}, {pipeline_mode = #tpu.pipeline_mode<synchronous>, transform_indices = @transform_1, window_bounds = array<i64: 32, 96>}, {pipeline_mode = #tpu.pipeline_mode<synchronous>, transform_indices = @transform_2, window_bounds = array<i64: 1, 96>}, {pipeline_mode = #tpu.pipeline_mode<synchronous>, transform_indices = @transform_3, window_bounds = array<i64: 32, 32>}, {pipeline_mode = #tpu.pipeline_mode<synchronous>, transform_indices = @transform_4, window_bounds = array<i64: 1, 32>}, {pipeline_mode = #tpu.pipeline_mode<synchronous>, transform_indices = @transform_5, window_bounds = array<i64: 1, 32>}, {pipeline_mode = #tpu.pipeline_mode<synchronous>, transform_indices = @transform_6, window_bounds = array<i64: 1, 32>}, {transform_indices = @transform_7, window_bounds = array<i64: 1, 8, 32>}]} {
    %c0 = arith.constant 0 : index
    %c0_0 = arith.constant 0 : index
    %c0_1 = arith.constant 0 : index
    %0 = vector.load %arg1[%c0, %c0_0, %c0_1] : memref<1x8x32xf32, #tpu.memory_space<vmem>>, vector<1x8x32xf32>
    %1 = vector.shape_cast %0 : vector<1x8x32xf32> to vector<8x32xf32>
    %c0_2 = arith.constant 0 : index
    %c0_3 = arith.constant 0 : index
    %2 = vector.load %arg2[%c0_2, %c0_3] : memref<32x96xf32, #tpu.memory_space<vmem>>, vector<32x96xf32>
    %cst = arith.constant dense<0.000000e+00> : vector<8x96xf32>
    %3 = tpu.matmul %1, %2, %cst {dimension_numbers = #tpu.dot_dimension_numbers<[1], [0], [0], [1], [0, 0, 1, 1], [], []>, precision = #tpu.contract_precision<fp32>} : vector<8x32xf32>, vector<32x96xf32>, vector<8x96xf32> -> vector<8x96xf32>
    %c0_4 = arith.constant 0 : index
    %c0_5 = arith.constant 0 : index
    %4 = vector.load %arg3[%c0_4, %c0_5] : memref<1x96xf32, #tpu.memory_space<vmem>>, vector<1x96xf32>
    %5 = vector.broadcast %4 : vector<1x96xf32> to vector<8x96xf32>
    %6 = arith.addf %3, %5 : vector<8x96xf32>
    %7 = vector.extract_strided_slice %6 {offsets = [0, 0], sizes = [8, 32], strides = [1, 1]} : vector<8x96xf32> to vector<8x32xf32>
    %8 = vector.extract_strided_slice %6 {offsets = [0, 32], sizes = [8, 32], strides = [1, 1]} : vector<8x96xf32> to vector<8x32xf32>
    %9 = vector.extract_strided_slice %6 {offsets = [0, 64], sizes = [8, 32], strides = [1, 1]} : vector<8x96xf32> to vector<8x32xf32>
    %10 = vector.extract_strided_slice %7 {offsets = [0, 0], sizes = [8, 8], strides = [1, 1]} : vector<8x32xf32> to vector<8x8xf32>
    %cst_6 = arith.constant 0.353553385 : f32
    %11 = vector.broadcast %cst_6 : f32 to vector<8x8xf32>
    %12 = arith.mulf %10, %11 : vector<8x8xf32>
    %13 = vector.extract_strided_slice %8 {offsets = [0, 0], sizes = [8, 8], strides = [1, 1]} : vector<8x32xf32> to vector<8x8xf32>
    %cst_7 = arith.constant dense<0.000000e+00> : vector<8x8xf32>
    %14 = tpu.matmul %12, %13, %cst_7 {dimension_numbers = #tpu.dot_dimension_numbers<[1], [1], [0], [0], [0, 0, 1, 0], [], []>, precision = #tpu.contract_precision<fp32>} : vector<8x8xf32>, vector<8x8xf32>, vector<8x8xf32> -> vector<8x8xf32>
    %cst_8 = arith.constant dense<0xFF800000> : vector<8xf32>
    %15 = vector.multi_reduction <maximumf>, %14, %cst_8 [1] : vector<8x8xf32> to vector<8xf32>
    %16 = vector.shape_cast %15 : vector<8xf32> to vector<8x1xf32>
    %17 = vector.broadcast %16 : vector<8x1xf32> to vector<8x8xf32>
    %18 = arith.subf %14, %17 : vector<8x8xf32>
    %19 = math.exp %18 : vector<8x8xf32>
    %cst_9 = arith.constant dense<0.000000e+00> : vector<8xf32>
    %20 = vector.multi_reduction <add>, %19, %cst_9 [1] : vector<8x8xf32> to vector<8xf32>
    %21 = vector.shape_cast %20 : vector<8xf32> to vector<8x1xf32>
    %22 = tpu.reciprocal %21 : vector<8x1xf32> -> vector<8x1xf32>
    %23 = vector.broadcast %22 : vector<8x1xf32> to vector<8x8xf32>
    %24 = arith.mulf %19, %23 : vector<8x8xf32>
    %25 = vector.extract_strided_slice %9 {offsets = [0, 0], sizes = [8, 8], strides = [1, 1]} : vector<8x32xf32> to vector<8x8xf32>
    %cst_10 = arith.constant dense<0.000000e+00> : vector<8x8xf32>
    %26 = tpu.matmul %24, %25, %cst_10 {dimension_numbers = #tpu.dot_dimension_numbers<[1], [0], [0], [1], [0, 0, 1, 1], [], []>, precision = #tpu.contract_precision<fp32>} : vector<8x8xf32>, vector<8x8xf32>, vector<8x8xf32> -> vector<8x8xf32>
    %c0_11 = arith.constant 0 : index
    %c0_12 = arith.constant 0 : index
    %27 = vector.load %arg9[%c0_11, %c0_12] : memref<8x32xf32, #tpu.memory_space<vmem>>, vector<8x8xf32>
    tpu.vector_store %arg9[%c0_11, %c0_12], %26 {strides = array<i32>} : memref<8x32xf32, #tpu.memory_space<vmem>>, vector<8x8xf32>,
    %28 = vector.extract_strided_slice %7 {offsets = [0, 8], sizes = [8, 8], strides = [1, 1]} : vector<8x32xf32> to vector<8x8xf32>
    %cst_13 = arith.constant 0.353553385 : f32
    %29 = vector.broadcast %cst_13 : f32 to vector<8x8xf32>
    %30 = arith.mulf %28, %29 : vector<8x8xf32>
    %31 = vector.extract_strided_slice %8 {offsets = [0, 8], sizes = [8, 8], strides = [1, 1]} : vector<8x32xf32> to vector<8x8xf32>
    %cst_14 = arith.constant dense<0.000000e+00> : vector<8x8xf32>
    %32 = tpu.matmul %30, %31, %cst_14 {dimension_numbers = #tpu.dot_dimension_numbers<[1], [1], [0], [0], [0, 0, 1, 0], [], []>, precision = #tpu.contract_precision<fp32>} : vector<8x8xf32>, vector<8x8xf32>, vector<8x8xf32> -> vector<8x8xf32>
    %cst_15 = arith.constant dense<0xFF800000> : vector<8xf32>
    %33 = vector.multi_reduction <maximumf>, %32, %cst_15 [1] : vector<8x8xf32> to vector<8xf32>
    %34 = vector.shape_cast %33 : vector<8xf32> to vector<8x1xf32>
    %35 = vector.broadcast %34 : vector<8x1xf32> to vector<8x8xf32>
    %36 = arith.subf %32, %35 : vector<8x8xf32>
    %37 = math.exp %36 : vector<8x8xf32>
    %cst_16 = arith.constant dense<0.000000e+00> : vector<8xf32>
    %38 = vector.multi_reduction <add>, %37, %cst_16 [1] : vector<8x8xf32> to vector<8xf32>
    %39 = vector.shape_cast %38 : vector<8xf32> to vector<8x1xf32>
    %40 = tpu.reciprocal %39 : vector<8x1xf32> -> vector<8x1xf32>
    %41 = vector.broadcast %40 : vector<8x1xf32> to vector<8x8xf32>
    %42 = arith.mulf %37, %41 : vector<8x8xf32>
    %43 = vector.extract_strided_slice %9 {offsets = [0, 8], sizes = [8, 8], strides = [1, 1]} : vector<8x32xf32> to vector<8x8xf32>
    %cst_17 = arith.constant dense<0.000000e+00> : vector<8x8xf32>
    %44 = tpu.matmul %42, %43, %cst_17 {dimension_numbers = #tpu.dot_dimension_numbers<[1], [0], [0], [1], [0, 0, 1, 1], [], []>, precision = #tpu.contract_precision<fp32>} : vector<8x8xf32>, vector<8x8xf32>, vector<8x8xf32> -> vector<8x8xf32>
    %c0_18 = arith.constant 0 : index
    %c8 = arith.constant 8 : index
    %45 = vector.load %arg9[%c0_18, %c8] : memref<8x32xf32, #tpu.memory_space<vmem>>, vector<8x8xf32>
    tpu.vector_store %arg9[%c0_18, %c8], %44 {strides = array<i32>} : memref<8x32xf32, #tpu.memory_space<vmem>>, vector<8x8xf32>,
    %46 = vector.extract_strided_slice %7 {offsets = [0, 16], sizes = [8, 8], strides = [1, 1]} : vector<8x32xf32> to vector<8x8xf32>
    %cst_19 = arith.constant 0.353553385 : f32
    %47 = vector.broadcast %cst_19 : f32 to vector<8x8xf32>
    %48 = arith.mulf %46, %47 : vector<8x8xf32>
    %49 = vector.extract_strided_slice %8 {offsets = [0, 16], sizes = [8, 8], strides = [1, 1]} : vector<8x32xf32> to vector<8x8xf32>
    %cst_20 = arith.constant dense<0.000000e+00> : vector<8x8xf32>
    %50 = tpu.matmul %48, %49, %cst_20 {dimension_numbers = #tpu.dot_dimension_numbers<[1], [1], [0], [0], [0, 0, 1, 0], [], []>, precision = #tpu.contract_precision<fp32>} : vector<8x8xf32>, vector<8x8xf32>, vector<8x8xf32> -> vector<8x8xf32>
    %cst_21 = arith.constant dense<0xFF800000> : vector<8xf32>
    %51 = vector.multi_reduction <maximumf>, %50, %cst_21 [1] : vector<8x8xf32> to vector<8xf32>
    %52 = vector.shape_cast %51 : vector<8xf32> to vector<8x1xf32>
    %53 = vector.broadcast %52 : vector<8x1xf32> to vector<8x8xf32>
    %54 = arith.subf %50, %53 : vector<8x8xf32>
    %55 = math.exp %54 : vector<8x8xf32>
    %cst_22 = arith.constant dense<0.000000e+00> : vector<8xf32>
    %56 = vector.multi_reduction <add>, %55, %cst_22 [1] : vector<8x8xf32> to vector<8xf32>
    %57 = vector.shape_cast %56 : vector<8xf32> to vector<8x1xf32>
    %58 = tpu.reciprocal %57 : vector<8x1xf32> -> vector<8x1xf32>
    %59 = vector.broadcast %58 : vector<8x1xf32> to vector<8x8xf32>
    %60 = arith.mulf %55, %59 : vector<8x8xf32>
    %61 = vector.extract_strided_slice %9 {offsets = [0, 16], sizes = [8, 8], strides = [1, 1]} : vector<8x32xf32> to vector<8x8xf32>
    %cst_23 = arith.constant dense<0.000000e+00> : vector<8x8xf32>
    %62 = tpu.matmul %60, %61, %cst_23 {dimension_numbers = #tpu.dot_dimension_numbers<[1], [0], [0], [1], [0, 0, 1, 1], [], []>, precision = #tpu.contract_precision<fp32>} : vector<8x8xf32>, vector<8x8xf32>, vector<8x8xf32> -> vector<8x8xf32>
    %c0_24 = arith.constant 0 : index
    %c16 = arith.constant 16 : index
    %63 = vector.load %arg9[%c0_24, %c16] : memref<8x32xf32, #tpu.memory_space<vmem>>, vector<8x8xf32>
    tpu.vector_store %arg9[%c0_24, %c16], %62 {strides = array<i32>} : memref<8x32xf32, #tpu.memory_space<vmem>>, vector<8x8xf32>,
    %64 = vector.extract_strided_slice %7 {offsets = [0, 24], sizes = [8, 8], strides = [1, 1]} : vector<8x32xf32> to vector<8x8xf32>
    %cst_25 = arith.constant 0.353553385 : f32
    %65 = vector.broadcast %cst_25 : f32 to vector<8x8xf32>
    %66 = arith.mulf %64, %65 : vector<8x8xf32>
    %67 = vector.extract_strided_slice %8 {offsets = [0, 24], sizes = [8, 8], strides = [1, 1]} : vector<8x32xf32> to vector<8x8xf32>
    %cst_26 = arith.constant dense<0.000000e+00> : vector<8x8xf32>
    %68 = tpu.matmul %66, %67, %cst_26 {dimension_numbers = #tpu.dot_dimension_numbers<[1], [1], [0], [0], [0, 0, 1, 0], [], []>, precision = #tpu.contract_precision<fp32>} : vector<8x8xf32>, vector<8x8xf32>, vector<8x8xf32> -> vector<8x8xf32>
    %cst_27 = arith.constant dense<0xFF800000> : vector<8xf32>
    %69 = vector.multi_reduction <maximumf>, %68, %cst_27 [1] : vector<8x8xf32> to vector<8xf32>
    %70 = vector.shape_cast %69 : vector<8xf32> to vector<8x1xf32>
    %71 = vector.broadcast %70 : vector<8x1xf32> to vector<8x8xf32>
    %72 = arith.subf %68, %71 : vector<8x8xf32>
    %73 = math.exp %72 : vector<8x8xf32>
    %cst_28 = arith.constant dense<0.000000e+00> : vector<8xf32>
    %74 = vector.multi_reduction <add>, %73, %cst_28 [1] : vector<8x8xf32> to vector<8xf32>
    %75 = vector.shape_cast %74 : vector<8xf32> to vector<8x1xf32>
    %76 = tpu.reciprocal %75 : vector<8x1xf32> -> vector<8x1xf32>
    %77 = vector.broadcast %76 : vector<8x1xf32> to vector<8x8xf32>
    %78 = arith.mulf %73, %77 : vector<8x8xf32>
    %79 = vector.extract_strided_slice %9 {offsets = [0, 24], sizes = [8, 8], strides = [1, 1]} : vector<8x32xf32> to vector<8x8xf32>
    %cst_29 = arith.constant dense<0.000000e+00> : vector<8x8xf32>
    %80 = tpu.matmul %78, %79, %cst_29 {dimension_numbers = #tpu.dot_dimension_numbers<[1], [0], [0], [1], [0, 0, 1, 1], [], []>, precision = #tpu.contract_precision<fp32>} : vector<8x8xf32>, vector<8x8xf32>, vector<8x8xf32> -> vector<8x8xf32>
    %c0_30 = arith.constant 0 : index
    %c24 = arith.constant 24 : index
    %81 = vector.load %arg9[%c0_30, %c24] : memref<8x32xf32, #tpu.memory_space<vmem>>, vector<8x8xf32>
    tpu.vector_store %arg9[%c0_30, %c24], %80 {strides = array<i32>} : memref<8x32xf32, #tpu.memory_space<vmem>>, vector<8x8xf32>,
    %c0_31 = arith.constant 0 : index
    %c0_32 = arith.constant 0 : index
    %82 = vector.load %arg9[%c0_31, %c0_32] : memref<8x32xf32, #tpu.memory_space<vmem>>, vector<8x32xf32>
    %c0_33 = arith.constant 0 : index
    %c0_34 = arith.constant 0 : index
    %83 = vector.load %arg4[%c0_33, %c0_34] : memref<32x32xf32, #tpu.memory_space<vmem>>, vector<32x32xf32>
    %cst_35 = arith.constant dense<0.000000e+00> : vector<8x32xf32>
    %84 = tpu.matmul %82, %83, %cst_35 {dimension_numbers = #tpu.dot_dimension_numbers<[1], [0], [0], [1], [0, 0, 1, 1], [], []>, precision = #tpu.contract_precision<fp32>} : vector<8x32xf32>, vector<32x32xf32>, vector<8x32xf32> -> vector<8x32xf32>
    %c0_36 = arith.constant 0 : index
    %c0_37 = arith.constant 0 : index
    %85 = vector.load %arg5[%c0_36, %c0_37] : memref<1x32xf32, #tpu.memory_space<vmem>>, vector<1x32xf32>
    %86 = vector.broadcast %85 : vector<1x32xf32> to vector<8x32xf32>
    %87 = arith.addf %84, %86 : vector<8x32xf32>
    %88 = arith.addf %1, %87 : vector<8x32xf32>
    %cst_38 = arith.constant dense<0.000000e+00> : vector<8xf32>
    %89 = vector.multi_reduction <add>, %88, %cst_38 [1] : vector<8x32xf32> to vector<8xf32>
    %90 = vector.shape_cast %89 : vector<8xf32> to vector<8x1xf32>
    %cst_39 = arith.constant 3.200000e+01 : f32
    %91 = vector.broadcast %cst_39 : f32 to vector<8x1xf32>
    %92 = arith.divf %90, %91 : vector<8x1xf32>
    %93 = vector.broadcast %92 : vector<8x1xf32> to vector<8x32xf32>
    %94 = arith.subf %88, %93 : vector<8x32xf32>
    %95 = arith.mulf %94, %94 : vector<8x32xf32>
    %cst_40 = arith.constant dense<0.000000e+00> : vector<8xf32>
    %96 = vector.multi_reduction <add>, %95, %cst_40 [1] : vector<8x32xf32> to vector<8xf32>
    %97 = vector.shape_cast %96 : vector<8xf32> to vector<8x1xf32>
    %cst_41 = arith.constant 3.200000e+01 : f32
    %98 = vector.broadcast %cst_41 : f32 to vector<8x1xf32>
    %99 = arith.divf %97, %98 : vector<8x1xf32>
    %cst_42 = arith.constant 9.99999974E-6 : f32
    %100 = vector.broadcast %cst_42 : f32 to vector<8x1xf32>
    %101 = arith.addf %99, %100 : vector<8x1xf32>
    %102 = math.rsqrt %101 : vector<8x1xf32>
    %103 = vector.broadcast %102 : vector<8x1xf32> to vector<8x32xf32>
    %104 = arith.mulf %94, %103 : vector<8x32xf32>
    %c0_43 = arith.constant 0 : index
    %c0_44 = arith.constant 0 : index
    %105 = vector.load %arg6[%c0_43, %c0_44] : memref<1x32xf32, #tpu.memory_space<vmem>>, vector<1x32xf32>
    %106 = vector.broadcast %105 : vector<1x32xf32> to vector<8x32xf32>
    %107 = arith.mulf %104, %106 : vector<8x32xf32>
    %c0_45 = arith.constant 0 : index
    %c0_46 = arith.constant 0 : index
    %108 = vector.load %arg7[%c0_45, %c0_46] : memref<1x32xf32, #tpu.memory_space<vmem>>, vector<1x32xf32>
    %109 = vector.broadcast %108 : vector<1x32xf32> to vector<8x32xf32>
    %110 = arith.addf %107, %109 : vector<8x32xf32>
    %c0_47 = arith.constant 0 : index
    %c0_48 = arith.constant 0 : index
    %c0_49 = arith.constant 0 : index
    %111 = vector.load %arg8[%c0_47, %c0_48, %c0_49] : memref<1x8x32xf32, #tpu.memory_space<vmem>>, vector<1x8x32xf32>
    %112 = vector.shape_cast %111 : vector<1x8x32xf32> to vector<8x32xf32>
    %113 = vector.shape_cast %110 : vector<8x32xf32> to vector<1x8x32xf32>
    tpu.vector_store %arg8[%c0_47, %c0_48, %c0_49], %113 {strides = array<i32>} : memref<1x8x32xf32, #tpu.memory_space<vmem>>, vector<1x8x32xf32>,
    return
  }
  func.func @transform_0(%arg0: i32) -> (i32, i32, i32) {
    %c0_i32 = arith.constant 0 : i32
    %c0_i32_0 = arith.constant 0 : i32
    %c0_i32_1 = arith.constant 0 : i32
    return %arg0, %c0_i32, %c0_i32_0 : i32, i32, i32
  }
  func.func @transform_1(%arg0: i32) -> (i32, i32) {
    %c0_i32 = arith.constant 0 : i32
    %c0_i32_0 = arith.constant 0 : i32
    %c0_i32_1 = arith.constant 0 : i32
    return %c0_i32, %c0_i32_0 : i32, i32
  }
  func.func @transform_2(%arg0: i32) -> (i32, i32) {
    %c0_i32 = arith.constant 0 : i32
    %c0_i32_0 = arith.constant 0 : i32
    %c0_i32_1 = arith.constant 0 : i32
    return %c0_i32, %c0_i32_0 : i32, i32
  }
  func.func @transform_3(%arg0: i32) -> (i32, i32) {
    %c0_i32 = arith.constant 0 : i32
    %c0_i32_0 = arith.constant 0 : i32
    %c0_i32_1 = arith.constant 0 : i32
    return %c0_i32, %c0_i32_0 : i32, i32
  }
  func.func @transform_4(%arg0: i32) -> (i32, i32) {
    %c0_i32 = arith.constant 0 : i32
    %c0_i32_0 = arith.constant 0 : i32
    %c0_i32_1 = arith.constant 0 : i32
    return %c0_i32, %c0_i32_0 : i32, i32
  }
  func.func @transform_5(%arg0: i32) -> (i32, i32) {
    %c0_i32 = arith.constant 0 : i32
    %c0_i32_0 = arith.constant 0 : i32
    %c0_i32_1 = arith.constant 0 : i32
    return %c0_i32, %c0_i32_0 : i32, i32
  }
  func.func @transform_6(%arg0: i32) -> (i32, i32) {
    %c0_i32 = arith.constant 0 : i32
    %c0_i32_0 = arith.constant 0 : i32
    %c0_i32_1 = arith.constant 0 : i32
    return %c0_i32, %c0_i32_0 : i32, i32
  }
  func.func @transform_7(%arg0: i32) -> (i32, i32, i32) {
    %c0_i32 = arith.constant 0 : i32
    %c0_i32_0 = arith.constant 0 : i32
    %c0_i32_1 = arith.constant 0 : i32
    return %arg0, %c0_i32, %c0_i32_0 : i32, i32, i32
  }
}

</mosaic_0001>

<bundles_post_ra>
// kernel: tpu_custom_call.1
= control target key start
LH: loop header
LB: loop body
LE: loop exit
PB: predicated region body
PF: predicated region fallthrough
CT: control target
= control target key end

     0   :  { %12 = vsyncpa [#allocation4], 0  ;;  %s6699_s0 = inlined_call_operand.hbm [shape: f32[2,8,32], index: 0, kind: input, shape index: {}]   ;;  %s6700_s1 = inlined_call_operand.hbm [shape: f32[32,96], index: 1, kind: input, shape index: {}]   ;;  %s6701_s2 = inlined_call_operand.vmem [shape: f32[1,96], index: 2, kind: input, shape index: {}]   ;;  %s6702_s3 = inlined_call_operand.hbm [shape: f32[32,32], index: 3, kind: input, shape index: {}]   ;;  %s6703_s4 = inlined_call_operand.vmem [shape: f32[1,32], index: 4, kind: input, shape index: {}]   ;;  %s6704_s5 = inlined_call_operand.vmem [shape: f32[1,32], index: 5, kind: input, shape index: {}]   ;;  %s6705_s6 = inlined_call_operand.vmem [shape: f32[1,32], index: 6, kind: input, shape index: {}]   ;;  %s6706_s7 = inlined_call_operand.hbm [shape: f32[2,8,32], index: 7, kind: output, shape index: {}]  }
   0x1   :  { %14 = vsyncpa [#allocation4 + $0x1], 0 }
   0x2   :  { %15 = vsyncpa [#allocation7], 0 }
   0x3   :  { %16 = vsyncpa [#allocation5], 0 }
   0x4   :  { %18 = vsyncpa [#allocation5 + $0x1], 0  ;;  %s6185_s24 = smov 0   ;;  %s6187_s25 = smov 0  }
   0x5   :  { %s6189_s26 = smov 0   ;;  %s6191_s27 = smov 0  }
   0x6 LB: > { %s6206_s28 = sadd.s32 4294967295, %s6120_s27   ;;  %s5148_s29 = sadd.s32 4294967294, %s6120_s27   ;;  %s6120_s27 = sphi %s6191_s27, %s6726_s27   ;;  %s6116_s26 = sphi %s6189_s26, %s6725_s26   ;;  %s6112_s25 = sphi %s6187_s25, %s6724_s25   ;;  %s6108_s24 = sphi %s6185_s24, %s6723_s24  }
   0x7   : > { %p44_p0 = scmp.ne.s32.totalorder %s6112_s25, %s6108_s24  ;;  %p6707_p1 = scmp.eq.s32.totalorder %s6206_s28, 0 }
   0x8   : > { %p200_p3 = scmp.eq.s32.totalorder %s5148_s29, 1  ;;  %p5149_p5 = scmp.ge.s32.totalorder %s6120_s27, 1 }
   0x9   : > { %p6215_p4 = por %p6707_p1, %p44_p0  ;;  %p207_p7 = scmp.lt.s32.totalorder %s6120_s27, 3 }
   0xa   : > { %p6220_p6 = por %p200_p3, %p44_p0  ;;  %s6122_s10 = smov [#allocation6]  }
   0xb   : > { %s6710_s30 = scalar_select %p6215_p4, 1, 0 }
   0xc   : > { %s6711_s8 = scalar_select %p6220_p6, 1, 0 }
   0xd   : > { %p6225_p8 = pnand %p5149_p5, %p207_p7  ;;  %s219_s11 = sshll.u32 %s6122_s10, 4  ;;  %s6229_s11 = int_to_ptr.vmem [resolvable:$true] %s219_s11 }
   0xe   : > { %s6123_s13 = smov [#allocation8]   ;;  %s5964_s17 = scalar_lea.hbm %s6700_s1, 512 }
   0xf   : > { %p5871_p9 = pneg %p6225_p8  ;;  %s235_s14 = sshll.u32 %s6123_s13, 4  ;;  %s6240_s14 = int_to_ptr.vmem [resolvable:$true] %s235_s14 }
  0x10   : > { %p5965_p12 = scmp.ne.s32.totalorder %s6700_s1, %s5964_s17  ;;  %p5971_p5 = scmp.lt.u32.totalorder %s5964_s17, %s6700_s1 }
  0x11   : > { %p6236_p11 = pnand %p5871_p9, %p6707_p1 }
  0x13   : > { %p5966_p13 = pneg %p6236_p11 }
  0x15   : > { %p5967_p0 = pnand %p5966_p13, %p5965_p12 }
  0x17   : > { %p5968_p3 = pneg %p5967_p0 }
  0x19   : > { %p5973_p7 = pnand %p5971_p5, %p5968_p3 }
  0x1b   : > { %5976 = shalt.err (!%p5973_p7)
}
  0x1c   : > { %s5977_s22 = scalar_lea.vmem %s6229_s11, 512  ;;  %p5985_p2 = scmp.lt.s32.totalorder %s6229_s11, %s6229_s11 }
  0x1d   : > { %p5978_p9 = scmp.ne.s32.totalorder %s6229_s11, %s5977_s22  ;;  %p5986_p12 = scmp.lt.s32.totalorder %s5977_s22, %s5977_s22 }
  0x1f   : > { %p5980_p10 = pnand %p5978_p9, %p5966_p13  ;;  %p5987_p0 = por %p5986_p12, %p5985_p2 }
  0x21   : > { %p5981_p1 = pneg %p5980_p10 }
  0x23   : > { %p5988_p6 = pnand %p5987_p0, %p5981_p1 }
  0x25   : > { %5991 = shalt.err (!%p5988_p6)
}
  0x26   : > { %s6124_s23 = smov 128   ;;  %s6125_s29 = smov 8  }
  0x27   : > { %5874 = dma.hbm_to_vmem [thread:$0]  (!%p6236_p11), %s6700_s1, 512, %s6229_s11, [#allocation7], %s6124_s23, %s6124_s23, %s6125_s29  }
  0x28   : > { %s5992_s17 = scalar_lea.hbm %s6702_s3, 512 }
  0x29   : > { %p5993_p2 = scmp.ne.s32.totalorder %s6702_s3, %s5992_s17  ;;  %p5999_p10 = scmp.lt.u32.totalorder %s5992_s17, %s6702_s3 }
  0x2b   : > { %p5995_p1 = pnand %p5993_p2, %p5966_p13 }
  0x2d   : > { %p5996_p6 = pneg %p5995_p1 }
  0x2f   : > { %p6001_p3 = pnand %p5999_p10, %p5996_p6 }
  0x31   : > { %6004 = shalt.err (!%p6001_p3)
}
  0x32   : > { %s6005_s11 = scalar_lea.vmem %s6240_s14, 512  ;;  %p6013_p12 = scmp.lt.s32.totalorder %s6240_s14, %s6240_s14 }
  0x33   : > { %p6006_p5 = scmp.ne.s32.totalorder %s6240_s14, %s6005_s11  ;;  %p6014_p0 = scmp.lt.s32.totalorder %s6005_s11, %s6005_s11 }
  0x35   : > { %p6008_p7 = pnand %p6006_p5, %p5966_p13  ;;  %p6015_p2 = por %p6014_p0, %p6013_p12 }
  0x37   : > { %p6009_p9 = pneg %p6008_p7 }
  0x39   : > { %p6016_p1 = pnand %p6015_p2, %p6009_p9 }
  0x3b   : > { %6019 = shalt.err (!%p6016_p1)
}
  0x3c   : > { %5877 = dma.hbm_to_vmem [thread:$0]  (!%p6236_p11), %s6702_s3, 512, %s6240_s14, [#allocation7], %s6124_s23, %s6124_s23, %s6125_s29  }
  0x3d   : > { %s6295_s13 = sadd.s32 1, %s6120_s27   ;;  %s31_s12 = sadd.s32 1, %s6116_s26 }
  0x3e   : > { %s28_s15 = ssub.s32 %s6120_s27, %s6295_s13  ;;  %p38_p13 = scmp.ne.s32.totalorder %s6116_s26, %s6112_s25 }
  0x3f   : > { %p29_p6 = scmp.eq.s32.totalorder %s28_s15, 0  ;;  %p39_p10 = scmp.eq.s32.totalorder %s6120_s27, 0 }
  0x40   : > { %p6714_p3 = scmp.eq.s32.totalorder %s6206_s28, 1  ;;  %p5888_p7 = scmp.lt.s32.totalorder %s6120_s27, 2 }
  0x41   : > { %s6311_s17 = scalar_select %p29_p6, %s6116_s26, %s31_s12  }
  0x42   : > { %p6305_p5 = por %p6714_p3, %p38_p13  ;;  %p40_p9 = por %p39_p10, %p38_p13 }
  0x43   : > { %s258_s18 = sand.u32 1, %s6116_s26   ;;  %s5154_s14 = sshll.u32 %s6120_s27, 7 }
  0x44   : > { %s6715_s16 = scalar_select %p6305_p5, 1, 0 }
  0x45   : > { %s5153_s19 = sshll.u32 %s258_s18, 3  ;;  %s6318_s20 = scalar_lea.hbm %s6699_s0, %s5154_s14 }
  0x46   : > { %s262_s21 = scalar_lea.vmem [#allocation3], %s5153_s19  ;;  %p6322_p11 = pnand %p5888_p7, %p40_p9 }
  0x47   : > { %s269_s11 = sshll.u32 %s262_s21, 4  ;;  %s259_s10 = scalar_lea.sflag [#allocation4], %s258_s18  ;;  %s6320_s11 = int_to_ptr.vmem [resolvable:$true] %s269_s11 }
  0x48   : > { %s6020_s12 = scalar_lea.hbm %s6318_s20, 128  ;;  %p6022_p0 = pneg %p6322_p11 }
  0x49   : > { %p6021_p12 = scmp.ne.s32.totalorder %s6318_s20, %s6020_s12  ;;  %s6025_s14 = scalar_lea.hbm %s6699_s0, 256 }
  0x4a   : > { %p6026_p13 = scmp.lt.u32.totalorder %s6318_s20, %s6699_s0  ;;  %p6027_p6 = scmp.lt.u32.totalorder %s6025_s14, %s6020_s12 }
  0x4b   : > { %p6023_p2 = pnand %p6022_p0, %p6021_p12  ;;  %p6029_p3 = scmp.lt.u32.totalorder %s6020_s12, %s6318_s20 }
  0x4c   : > { %p6028_p10 = por %p6027_p6, %p6026_p13 }
  0x4d   : > { %p6024_p1 = pneg %p6023_p2 }
  0x4e   : > { %p6030_p7 = por %p6029_p3, %p6028_p10 }
  0x50   : > { %p6031_p9 = pnand %p6030_p7, %p6024_p1 }
  0x52   : > { %6034 = shalt.err (!%p6031_p9)
}
  0x53   : > { %s6035_s18 = scalar_lea.vmem %s6320_s11, 128  ;;  %s6126_s21 = smov [#allocation3]  }
  0x54   : > { %p6036_p12 = scmp.ne.s32.totalorder %s6320_s11, %s6035_s18  ;;  %s6040_s15 = sshll.u32 %s6126_s21, 4  ;;  %s6041_s15 = int_to_ptr.vmem [resolvable:$false] %s6040_s15 }
  0x55   : > { %s6042_s19 = scalar_lea.vmem %s6041_s15, 256  ;;  %p6043_p4 = scmp.lt.s32.totalorder %s6320_s11, %s6041_s15 }
  0x56   : > { %p6038_p2 = pnand %p6036_p12, %p6022_p0  ;;  %p6044_p13 = scmp.lt.s32.totalorder %s6042_s19, %s6035_s18 }
  0x58   : > { %p6039_p5 = pneg %p6038_p2  ;;  %p6045_p6 = por %p6044_p13, %p6043_p4 }
  0x5a   : > { %p6046_p10 = pnand %p6045_p6, %p6039_p5 }
  0x5c   : > { %6049 = shalt.err (!%p6046_p10)
}
  0x5d   : > { %5881 = dma.hbm_to_vmem [thread:$0]  (!%p6322_p11), %s6318_s20, 128, %s6320_s11, %s259_s10  }
  0x5e   : > { %278 = sbr.rel (%p6225_p8) target bundleno = 2150 (0x866), region = 48  ;;  %s6354_s12 = sand.u32 (!%p6225_p8), 1, %s6112_s25  }
  0x5f   : > { %s5156_s14 = sshll.u32 (!%p6225_p8), %s6354_s12, 3  ;;  %s281_s23 = scalar_lea.sflag (!%p6225_p8), [#allocation4], %s6354_s12 }
  0x60   : > { %s6360_s29 = scalar_lea.vmem (!%p6225_p8), [#allocation3], %s5156_s14  ;;  %p6717_p4 = scmp.ne.s32.totalorder (!%p6225_p8), %s6710_s30, 0 }
  0x65   : > { %6095 = dma.done.wait (%p6717_p4), %s281_s23, 128  }
  0x66   : > { %6097 = vsyncadd (%p6717_p4), %s281_s23, 4294967168  ;;  %p6718_p5 = scmp.eq.s32.totalorder %s6206_s28, 0 }
  0x68   : > { %6099 = dma.done.wait (%p6718_p5), [#allocation7], 1024   ;;  %p6719_p8 = pmov %p6718_p5 }
  0x69   : > { %v6127_v0 = vmov 0.0|0.0   ;;  %vm6128_vm0 = vmmov 0   ;;  %v6129_v1 = vmov 0.0   ;;  %vm335_vm1 = vcmask 261120   ;;  %v324_v2 = vld [vmem:[#allocation6] sm:$0xff]  ;;  %v325_v3 = vld [vmem:[#allocation6 + $0x8] sm:$0xff] }
  0x6a   : > { %6101 = vsyncadd (%p6719_p8), [#allocation7], 4294966272  ;;  %5696 = vmatprep.subr.bf16.mxu0 %v6127_v0  ;;  %5332 = vmatprep.mubr.msk.f32.mxu0 %vm6128_vm0, %v6129_v1  ;;  %v326_v4 = vld [vmem:[#allocation6 + $0x10] sm:$0xff]  ;;  %v340_v5 = vand.u32 4294901760, %v324_v2  ;;  %v343_v6 = vand.u32 4294901760, %v325_v3  ;;  %v327_v7 = vld [vmem:[#allocation6 + $0x18] sm:$0xff] }
  0x6b   : > { %5390 = vmatprep.subr.mxu1 %v6129_v1  ;;  %5392 = vmatprep.mubr.msk.f32.mxu1 %vm6128_vm0, %v6129_v1  ;;  %v346_v8 = vand.u32 4294901760, %v326_v4  ;;  %v323_v9 = vld [vmem:[%s6360_s29] sm:$0xff]  ;;  %v349_v10 = vand.u32 4294901760, %v327_v7  ;;  %v5160_v41 = vld [vmem:[%s6701_s2] ss:$0 sm:$0xff]  ;;  %s6130_s20 = smov 88  }
  0x6c   : > { %v337_v11 = vsel %vm335_vm1, %v323_v9, 0  ;;  %v5697_v12 = vpack.c.bf16 %v343_v6, %v340_v5  ;;  %v420_v13 = vsub.f32 %v324_v2, %v340_v5  ;;  %v427_v14 = vsub.f32 %v325_v3, %v343_v6  ;;  %s6131_s11 = smov 96   ;;  %s6132_s22 = smov 112  }
  0x6d   : > { %v434_v15 = vsub.f32 %v326_v4, %v346_v8  ;;  %v441_v16 = vsub.f32 %v327_v7, %v349_v10  ;;  %v408_v17 = vand.u32 4294901760, %v337_v11  ;;  %v5700_v18 = vpack.c.bf16 %v349_v10, %v346_v8  ;;  %s6133_s10 = smov 120   ;;  %s6134_s18 = smov 104  }
  0x6e   : > { %5698 = vmatpush3.bf16.msra.mxu0 %v5697_v12  ;;  %v421_v19 = vand.u32 4294901760, %v420_v13  ;;  %v428_v20 = vand.u32 4294901760, %v427_v14  ;;  %v5709_v37 = vpack.c.bf16 %v427_v14, %v420_v13  ;;  %s6135_s21 = smov 80   ;;  %s6136_s15 = smov 72   ;;  %vm828_vm2 = vcmask 64512  }
  0x6f   : > { %v435_v21 = vand.u32 4294901760, %v434_v15  ;;  %5699 = vmatprep.subr.bf16.mxu0 %v6127_v0  ;;  %v409_v22 = vsub.f32 %v337_v11, %v408_v17  ;;  %v442_v23 = vand.u32 4294901760, %v441_v16  ;;  %v5712_v38 = vpack.c.bf16 %v441_v16, %v434_v15  ;;  %s6137_s19 = smov 64   ;;  %s6138_s23 = smov 56  }
  0x70   : > { %v422_v24 = vsub.f32 %v420_v13, %v421_v19  ;;  %v429_v25 = vsub.f32 %v427_v14, %v428_v20  ;;  %v5721_v39 = vpack.c.bf16 %v428_v20, %v421_v19  ;;  %s6139_s30 = smov 48   ;;  %s6140_s9 = smov 40   ;;  %vm2665_vm3 = vcmask 130112  }
  0x71   : > { %v436_v26 = vsub.f32 %v434_v15, %v435_v21  ;;  %v410_v27 = vand.u32 4294901760, %v409_v22  ;;  %v443_v28 = vsub.f32 %v441_v16, %v442_v23  ;;  %v5724_v40 = vpack.c.bf16 %v442_v23, %v435_v21  ;;  %p6720_p0 = scmp.ne.s32.totalorder %s6715_s16, 0 }
  0x72   : > { %5701 = vmatpush3.bf16.msra.mxu0 %v5700_v18  ;;  %v423_v29 = vand.u32 4294901760, %v422_v24  ;;  %v430_v30 = vand.u32 4294901760, %v429_v25  ;;  %vm3588_vm4 = vcmask 195712   ;;  %vm4511_vm5 = vcmask 261312  }
  0x73   : > { %v411_v31 = vsub.f32 %v409_v22, %v410_v27  ;;  %5702 = vmatprep.subr.bf16.mxu0 %v6127_v0  ;;  %v437_v33 = vand.u32 4294901760, %v436_v26  ;;  %v444_v34 = vand.u32 4294901760, %v443_v28 }
  0x74   : > { %v5703_v32 = vpack.c.bf16 %v430_v30, %v423_v29 }
  0x75   : > { %v412_v35 = vand.u32 4294901760, %v411_v31  ;;  %v5706_v36 = vpack.c.bf16 %v444_v34, %v437_v33 }
  0x77   : > { %5333 = vmatmul.mubr.f32.vlgmr.msra.gmra.mrb[0].mxu0 %v412_v35 }
  0x78   : > { %5704 = vmatpush3.bf16.msra.mxu0 %v5703_v32  ;;  %5343 = vmatprep.mubr.msk.f32.mxu0 %vm6128_vm0, %v6129_v1 }
  0x79   : > { %5705 = vmatprep.subr.bf16.mxu0 %v6127_v0 }
  0x7c   : > { %5707 = vmatpush3.bf16.msra.mxu0 %v5706_v36 }
  0x7d   : > { %5708 = vmatprep.subr.bf16.mxu0 %v6127_v0 }
  0x7f   : > { %5344 = vmatmul.mubr.f32.vlgmr.msra.gmra.mrb[0].mxu0 %v408_v17 }
  0x80   : > { %5710 = vmatpush3.bf16.msra.mxu0 %v5709_v37  ;;  %5354 = vmatprep.mubr.msk.f32.mxu0 %vm6128_vm0, %v6129_v1 }
  0x81   : > { %5711 = vmatprep.subr.bf16.mxu0 %v6127_v0 }
  0x84   : > { %5713 = vmatpush3.bf16.msra.mxu0 %v5712_v38 }
  0x85   : > { %5714 = vmatprep.subr.bf16.mxu0 %v6127_v0 }
  0x87   : > { %5355 = vmatmul.mubr.f32.vlgmr.msra.gmra.mrb[0].mxu0 %v409_v22 }
  0x88   : > { %5716 = vmatpush3.bf16.msra.mxu0 %v5697_v12  ;;  %5365 = vmatprep.mubr.msk.f32.mxu0 %vm6128_vm0, %v6129_v1 }
  0x89   : > { %5717 = vmatprep.subr.bf16.mxu0 %v6127_v0 }
  0x8c   : > { %5719 = vmatpush3.bf16.msra.mxu0 %v5700_v18 }
  0x8d   : > { %5720 = vmatprep.subr.bf16.mxu0 %v6127_v0 }
  0x8f   : > { %5366 = vmatmul.mubr.f32.vlgmr.msra.gmra.mrb[0].mxu0 %v410_v27 }
  0x90   : > { %5722 = vmatpush3.bf16.msra.mxu0 %v5721_v39  ;;  %5376 = vmatprep.mubr.msk.f32.mxu0 %vm6128_vm0, %v6129_v1 }
  0x91   : > { %5723 = vmatprep.subr.bf16.mxu0 %v6127_v0 }
  0x94   : > { %5725 = vmatpush3.bf16.msra.mxu0 %v5724_v40 }
  0x95   : > { %5726 = vmatprep.subr.bf16.mxu0 %v6127_v0 }
  0x97   : > { %5377 = vmatmul.mubr.f32.vlgmr.msra.gmra.mrb[0].mxu0 %v408_v17 }
  0x98   : > { %5728 = vmatpush3.bf16.msra.mxu0 %v5697_v12  ;;  %5387 = vmatprep.mubr.msk.f32.mxu0 %vm6128_vm0, %v6129_v1 }
  0x99   : > { %5729 = vmatprep.subr.bf16.mxu0 %v6127_v0 }
  0x9c   : > { %5731 = vmatpush3.bf16.msra.mxu0 %v5700_v18 }
  0x9d   : > { %5450 = vmatprep.subr.mxu0 %v6129_v1 }
  0x9f   : > { %5388 = vmatmul.mubr.f32.vlgmr.msra.gmra.mrb[0].mxu0 %v408_v17 }
  0xa0   : > { %5452 = vmatprep.mubr.msk.f32.mxu0 %vm6128_vm0, %v6129_v1 }
 0x172   : > { %v820_v42 = vpop.f32.mrb[0].mxu0 }
 0x173   : > { %v6405_v43 = vadd.f32 %v5160_v41, %v820_v42  ;;  %v5389_v44 = vpop.f32.mrb[1].mxu0 }
 0x175   : > { %1746 = vrot.lane.b32.xlu1 %v6405_v43, %s6130_s20  ;;  %826 = vrot.lane.b32.xlu0 %v6405_v43, %s6131_s11  ;;  %v824_v45 = vmul.f32 0.35355338, %v6405_v43  ;;  %s6141_s20 = smov 8   ;;  %s6142_s11 = smov 16  }
 0x177   : > { %v830_v46 = vsel %vm828_vm2, %v824_v45, 0 }
 0x178   : > { %v6413_v47 = vand.u32 4294901760, %v830_v46 }
 0x179   : > { %2667 = vrot.lane.b32.xlu1 %v824_v45, %s6132_s22  ;;  %1744 = vrot.lane.b32.xlu0 %v824_v45, %s6133_s10  ;;  %s6143_s22 = smov 24   ;;  %s5046_s10 = scalar_lea.sflag [#allocation5], %s6354_s12 }
 0x17a   : > { %v901_v48 = vsub.f32 %v830_v46, %v6413_v47 }
 0x17c   : > { %v902_v49 = vand.u32 4294901760, %v901_v48 }
 0x17d   : > { %3590 = vrot.lane.b32.xlu1 %v824_v45, %s6134_s18  ;;  %2669 = vrot.lane.b32.xlu0 %v6405_v43, %s6135_s21 }
 0x17e   : > { %v903_v54 = vsub.f32 %v901_v48, %v902_v49 }
 0x180   : > { %v904_v61 = vand.u32 4294901760, %v903_v54 }
 0x181   : > { %3592 = vrot.lane.b32.xlu0 %v6405_v43, %s6136_s15 }
 0x1e7   : > { %v1747_v50 = vpop.permute.xlu1 %1746  ;;  %v827_v51 = vpop.permute.xlu0 %826 }
 0x1e8   : > { %v1750_v52 = vsel %vm828_vm2, %v1747_v50, 0  ;;  %v832_v53 = vsel %vm828_vm2, %v827_v51, 0 }
 0x1e9   : > { %v6418_v55 = vand.u32 4294901760, %v1750_v52  ;;  %v835_v56 = vand.u32 4294901760, %v832_v53 }
 0x1eb   : > { %v1830_v57 = vsub.f32 %v1750_v52, %v6418_v55  ;;  %v912_v58 = vsub.f32 %v832_v53, %v835_v56  ;;  %5391 = vmatpush3.xpose.msra.mxu1 %v835_v56  ;;  %5451 = vmatpush3.xpose.msra.mxu0 %v6418_v55  ;;  %v1745_v59 = vpop.permute.xlu0 %1744  ;;  %v2668_v11 = vpop.permute.xlu1 %2667 }
 0x1ec   : > { %v1748_v60 = vsel %vm828_vm2, %v1745_v59, 0  ;;  %5395 = vmatprep.subr.mxu1 %v6129_v1  ;;  %5455 = vmatprep.subr.mxu0 %v6129_v1  ;;  %v2671_v13 = vsel %vm828_vm2, %v2668_v11, 0 }
 0x1ed   : > { %v913_v62 = vand.u32 4294901760, %v912_v58  ;;  %v6425_v63 = vand.u32 4294901760, %v1748_v60  ;;  %v1831_v2 = vand.u32 4294901760, %v1830_v57  ;;  %v2741_v15 = vand.u32 4294901760, %v2671_v13 }
 0x1ee   : > { %5393 = vmatmul.mubr.f32.vlgmr.msra.gmra.mrb[0].mxu1 %v904_v61 }
 0x1ef   : > { %v914_v3 = vsub.f32 %v912_v58, %v913_v62  ;;  %v1819_v4 = vsub.f32 %v1748_v60, %v6425_v63  ;;  %5397 = vmatprep.mubr.msk.f32.mxu1 %vm6128_vm0, %v6129_v1  ;;  %v1832_v7 = vsub.f32 %v1830_v57, %v1831_v2  ;;  %v2670_v12 = vpop.permute.xlu0 %2669  ;;  %v2742_v17 = vsub.f32 %v2671_v13, %v2741_v15  ;;  %v3591_v25 = vpop.permute.xlu1 %3590 }
 0x1f0   : > { %v2673_v14 = vsel %vm828_vm2, %v2670_v12, 0  ;;  %v3594_v27 = vsel %vm828_vm2, %v3591_v25, 0 }
 0x1f1   : > { %v915_v5 = vand.u32 4294901760, %v914_v3  ;;  %v1820_v6 = vand.u32 4294901760, %v1819_v4  ;;  %v1833_v10 = vand.u32 4294901760, %v1832_v7  ;;  %v2676_v16 = vand.u32 4294901760, %v2673_v14 }
 0x1f2   : > { %v2743_v19 = vand.u32 4294901760, %v2742_v17  ;;  %v3664_v29 = vand.u32 4294901760, %v3594_v27 }
 0x1f3   : > { %v1821_v8 = vsub.f32 %v1819_v4, %v1820_v6  ;;  %5396 = vmatpush3.xpose.msra.mxu1 %v915_v5  ;;  %v2753_v18 = vsub.f32 %v2673_v14, %v2676_v16  ;;  %v3593_v26 = vpop.permute.xlu0 %3592 }
 0x1f4   : > { %5400 = vmatprep.subr.mxu1 %v6129_v1  ;;  %v2744_v21 = vsub.f32 %v2742_v17, %v2743_v19  ;;  %v3596_v28 = vsel %vm828_vm2, %v3593_v26, 0  ;;  %v3665_v31 = vsub.f32 %v3594_v27, %v3664_v29 }
 0x1f5   : > { %v1822_v9 = vand.u32 4294901760, %v1821_v8  ;;  %v2754_v20 = vand.u32 4294901760, %v2753_v18  ;;  %v3599_v30 = vand.u32 4294901760, %v3596_v28 }
 0x1f6   : > { %5398 = vmatmul.mubr.f32.vlgmr.msra.gmra.mrb[0].mxu1 %v6413_v47  ;;  %v2745_v23 = vand.u32 4294901760, %v2744_v21  ;;  %v3666_v33 = vand.u32 4294901760, %v3665_v31 }
 0x1f7   : > { %5401 = vmatpush3.xpose.msra.mxu1 %v912_v58  ;;  %5453 = vmatmul.mubr.f32.vlgmr.msra.gmra.mrb[2].mxu0 %v1822_v9  ;;  %v2755_v22 = vsub.f32 %v2753_v18, %v2754_v20  ;;  %v3676_v32 = vsub.f32 %v3596_v28, %v3599_v30 }
 0x1f8   : > { %5456 = vmatpush3.xpose.msra.mxu0 %v1833_v10  ;;  %5402 = vmatprep.mubr.msk.f32.mxu1 %vm6128_vm0, %v6129_v1  ;;  %v3667_v35 = vsub.f32 %v3665_v31, %v3666_v33 }
 0x1f9   : > { %5405 = vmatprep.subr.mxu1 %v6129_v1  ;;  %5457 = vmatprep.mubr.msk.f32.mxu0 %vm6128_vm0, %v6129_v1  ;;  %v2756_v24 = vand.u32 4294901760, %v2755_v22  ;;  %v3677_v34 = vand.u32 4294901760, %v3676_v32 }
 0x1fa   : > { %5460 = vmatprep.subr.mxu0 %v6129_v1  ;;  %v3668_v37 = vand.u32 4294901760, %v3667_v35 }
 0x1fb   : > { %v3678_v36 = vsub.f32 %v3676_v32, %v3677_v34 }
 0x1fd   : > { %v3679_v38 = vand.u32 4294901760, %v3678_v36 }
 0x1fe   : > { %5403 = vmatmul.mubr.f32.vlgmr.msra.gmra.mrb[0].mxu1 %v901_v48 }
 0x1ff   : > { %5406 = vmatpush3.xpose.msra.mxu1 %v835_v56  ;;  %5458 = vmatmul.mubr.f32.vlgmr.msra.gmra.mrb[2].mxu0 %v6425_v63 }
 0x200   : > { %5461 = vmatpush3.xpose.msra.mxu0 %v1830_v57  ;;  %5407 = vmatprep.mubr.msk.f32.mxu1 %vm6128_vm0, %v6129_v1 }
 0x201   : > { %5410 = vmatprep.subr.mxu1 %v6129_v1  ;;  %5462 = vmatprep.mubr.msk.f32.mxu0 %vm6128_vm0, %v6129_v1 }
 0x202   : > { %5465 = vmatprep.subr.mxu0 %v6129_v1 }
 0x206   : > { %5408 = vmatmul.mubr.f32.vlgmr.msra.gmra.mrb[0].mxu1 %v902_v49 }
 0x207   : > { %5411 = vmatpush3.xpose.msra.mxu1 %v913_v62  ;;  %5463 = vmatmul.mubr.f32.vlgmr.msra.gmra.mrb[2].mxu0 %v1819_v4 }
 0x208   : > { %5466 = vmatpush3.xpose.msra.mxu0 %v6418_v55  ;;  %5412 = vmatprep.mubr.msk.f32.mxu1 %vm6128_vm0, %v6129_v1 }
 0x209   : > { %5415 = vmatprep.subr.mxu1 %v6129_v1  ;;  %5467 = vmatprep.mubr.msk.f32.mxu0 %vm6128_vm0, %v6129_v1 }
 0x20a   : > { %5470 = vmatprep.subr.mxu0 %v6129_v1 }
 0x20e   : > { %5413 = vmatmul.mubr.f32.vlgmr.msra.gmra.mrb[0].mxu1 %v6413_v47 }
 0x20f   : > { %5416 = vmatpush3.xpose.msra.mxu1 %v835_v56  ;;  %5468 = vmatmul.mubr.f32.vlgmr.msra.gmra.mrb[2].mxu0 %v1820_v6 }
 0x210   : > { %5471 = vmatpush3.xpose.msra.mxu0 %v1831_v2  ;;  %5417 = vmatprep.mubr.msk.f32.mxu1 %vm6128_vm0, %v6129_v1 }
 0x211   : > { %5472 = vmatprep.mubr.msk.f32.mxu0 %vm6128_vm0, %v6129_v1  ;;  %5475 = vmatprep.subr.mxu0 %v6129_v1 }
 0x212   : > { %5420 = vmatprep.subr.mxu1 %v6129_v1 }
 0x216   : > { %5418 = vmatmul.mubr.f32.vlgmr.msra.gmra.mrb[0].mxu1 %v6413_v47 }
 0x217   : > { %5473 = vmatmul.mubr.f32.vlgmr.msra.gmra.mrb[2].mxu0 %v6425_v63  ;;  %5422 = vmatprep.mubr.msk.f32.mxu1 %vm6128_vm0, %v6129_v1 }
 0x218   : > { %5476 = vmatpush3.xpose.msra.mxu0 %v6418_v55  ;;  %5477 = vmatprep.mubr.msk.f32.mxu0 %vm6128_vm0, %v6129_v1 }
 0x219   : > { %5510 = vmatprep.subr.mxu0 %v6129_v1 }
 0x21f   : > { %5478 = vmatmul.mubr.f32.vlgmr.msra.gmra.mrb[2].mxu0 %v6425_v63 }
 0x220   : > { %5511 = vmatpush3.xpose.msra.mxu0 %v2676_v16  ;;  %5512 = vmatprep.mubr.msk.f32.mxu0 %vm6128_vm0, %v6129_v1 }
 0x221   : > { %5515 = vmatprep.subr.mxu0 %v6129_v1 }
 0x223   : > { %5513 = vmatmul.mubr.f32.vlgmr.msra.gmra.mrb[4].mxu0 %v2745_v23 }
 0x224   : > { %5516 = vmatpush3.xpose.msra.mxu0 %v2756_v24  ;;  %5517 = vmatprep.mubr.msk.f32.mxu0 %vm6128_vm0, %v6129_v1 }
 0x225   : > { %5520 = vmatprep.subr.mxu0 %v6129_v1 }
 0x22b   : > { %5518 = vmatmul.mubr.f32.vlgmr.msra.gmra.mrb[4].mxu0 %v2741_v15 }
 0x22c   : > { %5521 = vmatpush3.xpose.msra.mxu0 %v2753_v18  ;;  %5522 = vmatprep.mubr.msk.f32.mxu0 %vm6128_vm0, %v6129_v1 }
 0x22d   : > { %5525 = vmatprep.subr.mxu0 %v6129_v1 }
 0x233   : > { %5523 = vmatmul.mubr.f32.vlgmr.msra.gmra.mrb[4].mxu0 %v2742_v17 }
 0x234   : > { %5526 = vmatpush3.xpose.msra.mxu0 %v2676_v16  ;;  %5527 = vmatprep.mubr.msk.f32.mxu0 %vm6128_vm0, %v6129_v1 }
 0x235   : > { %5530 = vmatprep.subr.mxu0 %v6129_v1 }
 0x23b   : > { %5528 = vmatmul.mubr.f32.vlgmr.msra.gmra.mrb[4].mxu0 %v2743_v19 }
 0x23c   : > { %5531 = vmatpush3.xpose.msra.mxu0 %v2754_v20  ;;  %5532 = vmatprep.mubr.msk.f32.mxu0 %vm6128_vm0, %v6129_v1 }
 0x23d   : > { %5535 = vmatprep.subr.mxu0 %v6129_v1 }
 0x243   : > { %5533 = vmatmul.mubr.f32.vlgmr.msra.gmra.mrb[4].mxu0 %v2741_v15 }
 0x244   : > { %5536 = vmatpush3.xpose.msra.mxu0 %v2676_v16  ;;  %5537 = vmatprep.mubr.msk.f32.mxu0 %vm6128_vm0, %v6129_v1 }
 0x245   : > { %5570 = vmatprep.subr.mxu0 %v6129_v1 }
 0x24b   : > { %5538 = vmatmul.mubr.f32.vlgmr.msra.gmra.mrb[4].mxu0 %v2741_v15 }
 0x24c   : > { %5571 = vmatpush3.xpose.msra.mxu0 %v3599_v30  ;;  %5572 = vmatprep.mubr.msk.f32.mxu0 %vm6128_vm0, %v6129_v1 }
 0x24d   : > { %5575 = vmatprep.subr.mxu0 %v6129_v1 }
 0x24f   : > { %5573 = vmatmul.mubr.f32.vlgmr.msra.gmra.mrb[6].mxu0 %v3668_v37 }
 0x250   : > { %5576 = vmatpush3.xpose.msra.mxu0 %v3679_v38  ;;  %5577 = vmatprep.mubr.msk.f32.mxu0 %vm6128_vm0, %v6129_v1 }
 0x251   : > { %5580 = vmatprep.subr.mxu0 %v6129_v1 }
 0x257   : > { %5578 = vmatmul.mubr.f32.vlgmr.msra.gmra.mrb[6].mxu0 %v3664_v29 }
 0x258   : > { %5581 = vmatpush3.xpose.msra.mxu0 %v3676_v32  ;;  %5582 = vmatprep.mubr.msk.f32.mxu0 %vm6128_vm0, %v6129_v1 }
 0x259   : > { %5585 = vmatprep.subr.mxu0 %v6129_v1 }
 0x25f   : > { %5583 = vmatmul.mubr.f32.vlgmr.msra.gmra.mrb[6].mxu0 %v3665_v31 }
 0x260   : > { %5586 = vmatpush3.xpose.msra.mxu0 %v3599_v30  ;;  %5587 = vmatprep.mubr.msk.f32.mxu0 %vm6128_vm0, %v6129_v1 }
 0x261   : > { %5590 = vmatprep.subr.mxu0 %v6129_v1 }
 0x267   : > { %5588 = vmatmul.mubr.f32.vlgmr.msra.gmra.mrb[6].mxu0 %v3666_v33 }
 0x268   : > { %5591 = vmatpush3.xpose.msra.mxu0 %v3677_v34  ;;  %5592 = vmatprep.mubr.msk.f32.mxu0 %vm6128_vm0, %v6129_v1 }
 0x269   : > { %5595 = vmatprep.subr.mxu0 %v6129_v1 }
 0x26f   : > { %5593 = vmatmul.mubr.f32.vlgmr.msra.gmra.mrb[6].mxu0 %v3664_v29 }
 0x270   : > { %5596 = vmatpush3.xpose.msra.mxu0 %v3599_v30  ;;  %5597 = vmatprep.mubr.msk.f32.mxu0 %vm6128_vm0, %v6129_v1 }
 0x271   : > { %5732 = vmatprep.subr.bf16.mxu0 %v6127_v0 }
 0x277   : > { %5598 = vmatmul.mubr.f32.vlgmr.msra.gmra.mrb[6].mxu0 %v3664_v29 }
 0x278   : > { %5638 = vmatprep.mubr.msk.f32.mxu0 %vm6128_vm0, %v6129_v1 }
 0x2e9   : > { %v1276_v39 = vpop.f32.mrb[0].mxu1 }
 0x2ea   : > { %v5419_v40 = vpop.f32.mrb[1].mxu1  ;;  %v1280_v41 = vsel %vm828_vm2, %v1276_v39, -inf }
 0x2eb   : > { %1281 = vmax.xlane.f32.xlu1 %v1280_v41 }
 0x2f2   : > { %v2194_v42 = vpop.f32.mrb[2].mxu0 }
 0x2f3   : > { %v5479_v44 = vpop.f32.mrb[3].mxu0  ;;  %v2198_v45 = vsel %vm828_vm2, %v2194_v42, -inf }
 0x2f4   : > { %2199 = vmax.xlane.f32.xlu0 %v2198_v45 }
 0x31e   : > { %v3117_v46 = vpop.f32.mrb[4].mxu0 }
 0x31f   : > { %v5539_v47 = vpop.f32.mrb[5].mxu0  ;;  %v3121_v48 = vsel %vm828_vm2, %v3117_v46, -inf }
 0x320   : > { %3122 = vmax.xlane.f32.xlu1 %v3121_v48 }
 0x34a   : > { %v4040_v49 = vpop.f32.mrb[6].mxu0 }
 0x34b   : > { %v5599_v50 = vpop.f32.mrb[7].mxu0  ;;  %v4044_v51 = vsel %vm828_vm2, %v4040_v49, -inf }
 0x34c   : > { %4045 = vmax.xlane.f32.xlu1 %v4044_v51 }
 0x378   : > { %v1282_v52 = vpop.xlane.xlu1 %1281 }
 0x379   : > { %v1283_v53 = vsub.f32 %v1276_v39, %v1282_v52 }
 0x37b   : > { %v1284_v54 = vmul.f32 1.442695, %v1283_v53 }
 0x37d   : > { %5945 = vpow2.f32 %v1284_v54 }
 0x381   : > { %v2200_v55 = vpop.xlane.xlu0 %2199 }
 0x382   : > { %v2201_v56 = vsub.f32 %v2194_v42, %v2200_v55 }
 0x384   : > { %v2202_v57 = vmul.f32 1.442695, %v2201_v56 }
 0x386   : > { %5947 = vpow2.f32 %v2202_v57 }
 0x387   : > { %v5946_v58 = vpop.eup %5945 }
 0x388   : > { %v1286_v59 = vsel %vm828_vm2, %v5946_v58, 0.0 }
 0x389   : > { %1287 = vadd.xlane.f32.xlu0 %v1286_v59 }
 0x390   : > { %v5948_v60 = vpop.eup %5947 }
 0x391   : > { %v2204_v61 = vsel %vm828_vm2, %v5948_v60, 0.0 }
 0x392   : > { %2205 = vadd.xlane.f32.xlu1 %v2204_v61 }
 0x39f   : > { %1291 = vrot.lane.b32.xlu0 %v6405_v43, %s6137_s19 }
 0x3a3   : > { %2209 = vrot.lane.b32.xlu1 %v6405_v43, %s6138_s23  ;;  %s5165_s23 = sshll.u32 %s6206_s28, 7  ;;  %s6144_s28 = smov [#allocation9]  }
 0x3a7   : > { %3132 = vrot.lane.b32.xlu1 %v6405_v43, %s6139_s30  ;;  %s322_s30 = scalar_lea.vmem [#allocation9], %s5156_s14  ;;  %s6054_s14 = sshll.u32 %s6144_s28, 4  ;;  %s6055_s14 = int_to_ptr.vmem [resolvable:$false] %s6054_s14 }
 0x3ad   : > { %v3123_v62 = vpop.xlane.xlu1 %3122 }
 0x3ae   : > { %v3124_v63 = vsub.f32 %v3117_v46, %v3123_v62 }
 0x3b0   : > { %v3125_v2 = vmul.f32 1.442695, %v3124_v63 }
 0x3b2   : > { %5949 = vpow2.f32 %v3125_v2 }
 0x3bc   : > { %v6519_v3 = vpop.eup %5949 }
 0x3bd   : > { %v3127_v4 = vsel %vm828_vm2, %v6519_v3, 0.0 }
 0x3be   : > { %3128 = vadd.xlane.f32.xlu0 %v3127_v4 }
 0x3d4   : > { %4055 = vrot.lane.b32.xlu0 %v6405_v43, %s6140_s9  ;;  %s5059_s9 = sshll.u32 %s322_s30, 4  ;;  %s6656_s9 = int_to_ptr.vmem [resolvable:$true] %s5059_s9 }
 0x3d5   : > { %s6050_s18 = scalar_lea.vmem %s6656_s9, 128  ;;  %p6057_p7 = scmp.lt.s32.totalorder %s6656_s9, %s6055_s14 }
 0x3d6   : > { %p6051_p11 = scmp.ne.s32.totalorder %s6656_s9, %s6050_s18 }
 0x3d8   : > { %p6052_p1 = pnand %p6051_p11, %p6720_p0 }
 0x3d9   : > { %v4046_v5 = vpop.xlane.xlu1 %4045 }
 0x3da   : > { %v4047_v6 = vsub.f32 %v4040_v49, %v4046_v5  ;;  %p6053_p3 = pneg %p6052_p1 }
 0x3dc   : > { %v4048_v7 = vmul.f32 1.442695, %v4047_v6 }
 0x3de   : > { %5951 = vpow2.f32 %v4048_v7 }
 0x3e8   : > { %v6524_v8 = vpop.eup %5951 }
 0x3e9   : > { %v4050_v9 = vsel %vm828_vm2, %v6524_v8, 0.0 }
 0x3ea   : > { %4051 = vadd.xlane.f32.xlu1 %v4050_v9 }
 0x416   : > { %v1288_v10 = vpop.xlane.xlu0 %1287 }
 0x417   : > { %5953 = vrcp.f32 %v1288_v10 }
 0x41a   : > { %v1292_v11 = vpop.permute.xlu0 %1291 }
 0x41b   : > { %v1298_v12 = vand.u32 4294901760, %v1292_v11 }
 0x41d   : > { %5421 = vmatpush3.msra.mxu1 %v1298_v12  ;;  %v1375_v43 = vsub.f32 %v1292_v11, %v1298_v12 }
 0x41e   : > { %5425 = vmatprep.subr.mxu1 %v6129_v1 }
 0x41f   : > { %v1376_v17 = vand.u32 4294901760, %v1375_v43  ;;  %v2206_v24 = vpop.xlane.xlu1 %2205 }
 0x420   : > { %5955 = vrcp.f32 %v2206_v24 }
 0x421   : > { %v5954_v13 = vpop.eup %5953  ;;  %v1377_v20 = vsub.f32 %v1375_v43, %v1376_v17 }
 0x422   : > { %v1290_v14 = vmul.f32 %v5954_v13, %v5946_v58 }
 0x423   : > { %v1378_v23 = vand.u32 4294901760, %v1377_v20  ;;  %v2210_v28 = vpop.permute.xlu1 %2209  ;;  %v4517_v20 = vld [vmem:[#allocation8 + $0x18] sm:$0xff] }
 0x424   : > { %v1295_v15 = vsel %vm828_vm2, %v1290_v14, 0  ;;  %v2216_v30 = vand.u32 4294901760, %v2210_v28  ;;  %v4514_v14 = vld [vmem:[#allocation8] sm:$0xff]  ;;  %v4538_v24 = vand.u32 4294901760, %v4517_v20 }
 0x425   : > { %v1363_v16 = vand.u32 4294901760, %v1295_v15 }
 0x426   : > { %v2293_v32 = vsub.f32 %v2210_v28, %v2216_v30  ;;  %v4630_v28 = vsub.f32 %v4517_v20, %v4538_v24 }
 0x427   : > { %v1364_v18 = vsub.f32 %v1295_v15, %v1363_v16  ;;  %v3133_v44 = vpop.permute.xlu1 %3132  ;;  %v4529_v15 = vand.u32 4294901760, %v4514_v14 }
 0x428   : > { %v2294_v34 = vand.u32 4294901760, %v2293_v32  ;;  %v3139_v46 = vand.u32 4294901760, %v3133_v44 }
 0x429   : > { %v1365_v19 = vand.u32 4294901760, %v1364_v18 }
 0x42a   : > { %v5956_v25 = vpop.eup %5955  ;;  %v2295_v36 = vsub.f32 %v2293_v32, %v2294_v34  ;;  %v3216_v48 = vsub.f32 %v3133_v44, %v3139_v46 }
 0x42b   : > { %v1366_v21 = vsub.f32 %v1364_v18, %v1365_v19  ;;  %v2208_v26 = vmul.f32 %v5956_v25, %v5948_v60 }
 0x42c   : > { %v2296_v38 = vand.u32 4294901760, %v2295_v36  ;;  %v3217_v50 = vand.u32 4294901760, %v3216_v48 }
 0x42d   : > { %v1367_v22 = vand.u32 4294901760, %v1366_v21  ;;  %v2213_v27 = vsel %vm828_vm2, %v2208_v26, 0 }
 0x42e   : > { %v2281_v29 = vand.u32 4294901760, %v2213_v27  ;;  %v3218_v52 = vsub.f32 %v3216_v48, %v3217_v50 }
 0x42f   : > { %5423 = vmatmul.mubr.f32.vlgmr.msra.gmra.mrb[2].mxu1 %v1367_v22 }
 0x430   : > { %5426 = vmatpush3.msra.mxu1 %v1378_v23  ;;  %5427 = vmatprep.mubr.msk.f32.mxu1 %vm6128_vm0, %v6129_v1  ;;  %v2282_v31 = vsub.f32 %v2213_v27, %v2281_v29  ;;  %v3219_v54 = vand.u32 4294901760, %v3218_v52 }
 0x431   : > { %5430 = vmatprep.subr.mxu1 %v6129_v1 }
 0x432   : > { %v2283_v33 = vand.u32 4294901760, %v2282_v31 }
 0x434   : > { %v2284_v35 = vsub.f32 %v2282_v31, %v2283_v33 }
 0x436   : > { %v2285_v37 = vand.u32 4294901760, %v2284_v35 }
 0x437   : > { %5428 = vmatmul.mubr.f32.vlgmr.msra.gmra.mrb[2].mxu1 %v1363_v16 }
 0x438   : > { %5431 = vmatpush3.msra.mxu1 %v1375_v43  ;;  %5432 = vmatprep.mubr.msk.f32.mxu1 %vm6128_vm0, %v6129_v1  ;;  %v4515_v43 = vld [vmem:[#allocation8 + $0x8] sm:$0xff] }
 0x439   : > { %5435 = vmatprep.subr.mxu1 %v6129_v1 }
 0x43f   : > { %5433 = vmatmul.mubr.f32.vlgmr.msra.gmra.mrb[2].mxu1 %v1364_v18 }
 0x440   : > { %5436 = vmatpush3.msra.mxu1 %v1298_v12  ;;  %5437 = vmatprep.mubr.msk.f32.mxu1 %vm6128_vm0, %v6129_v1 }
 0x441   : > { %5440 = vmatprep.subr.mxu1 %v6129_v1 }
 0x447   : > { %5438 = vmatmul.mubr.f32.vlgmr.msra.gmra.mrb[2].mxu1 %v1365_v19  ;;  %v4516_v19 = vld [vmem:[#allocation8 + $0x10] sm:$0xff] }
 0x448   : > { %5441 = vmatpush3.msra.mxu1 %v1376_v17  ;;  %5442 = vmatprep.mubr.msk.f32.mxu1 %vm6128_vm0, %v6129_v1  ;;  %v6607_v17 = vsub.f32 %v4514_v14, %v4529_v15  ;;  %v4535_v23 = vand.u32 4294901760, %v4516_v19 }
 0x449   : > { %5445 = vmatprep.subr.mxu1 %v6129_v1 }
 0x44a   : > { %v4610_v21 = vand.u32 4294901760, %v6607_v17  ;;  %v4623_v27 = vsub.f32 %v4516_v19, %v4535_v23 }
 0x44b   : > { %v3129_v39 = vpop.xlane.xlu0 %3128 }
 0x44c   : > { %5957 = vrcp.f32 %v3129_v39  ;;  %v4611_v25 = vsub.f32 %v6607_v17, %v4610_v21 }
 0x44f   : > { %5443 = vmatmul.mubr.f32.vlgmr.msra.gmra.mrb[2].mxu1 %v1363_v16  ;;  %v4056_v59 = vpop.permute.xlu0 %4055 }
 0x450   : > { %5446 = vmatpush3.msra.mxu1 %v1298_v12  ;;  %5447 = vmatprep.mubr.msk.f32.mxu1 %vm6128_vm0, %v6129_v1  ;;  %v4062_v61 = vand.u32 4294901760, %v4056_v59 }
 0x451   : > { %5480 = vmatprep.subr.mxu1 %v6129_v1 }
 0x452   : > { %v4139_v63 = vsub.f32 %v4056_v59, %v4062_v61 }
 0x456   : > { %v5958_v40 = vpop.eup %5957 }
 0x457   : > { %5448 = vmatmul.mubr.f32.vlgmr.msra.gmra.mrb[2].mxu1 %v1363_v16  ;;  %v3131_v41 = vmul.f32 %v5958_v40, %v6519_v3  ;;  %v4140_v3 = vand.u32 4294901760, %v4139_v63  ;;  %v4532_v16 = vand.u32 4294901760, %v4515_v43 }
 0x458   : > { %5481 = vmatpush3.msra.mxu1 %v2216_v30  ;;  %5482 = vmatprep.mubr.msk.f32.mxu1 %vm6128_vm0, %v6129_v1 }
 0x459   : > { %5485 = vmatprep.subr.mxu1 %v6129_v1  ;;  %v3136_v42 = vsel %vm828_vm2, %v3131_v41, 0  ;;  %v4141_v5 = vsub.f32 %v4139_v63, %v4140_v3  ;;  %v6609_v18 = vsub.f32 %v4515_v43, %v4532_v16 }
 0x45a   : > { %v3204_v45 = vand.u32 4294901760, %v3136_v42 }
 0x45b   : > { %5483 = vmatmul.mubr.f32.vlgmr.msra.gmra.mrb[4].mxu1 %v2285_v37  ;;  %v4142_v7 = vand.u32 4294901760, %v4141_v5  ;;  %v4617_v22 = vand.u32 4294901760, %v6609_v18  ;;  %v5745_v44 = vpack.c.bf16 %v6609_v18, %v6607_v17 }
 0x45c   : > { %5486 = vmatpush3.msra.mxu1 %v2296_v38  ;;  %5487 = vmatprep.mubr.msk.f32.mxu1 %vm6128_vm0, %v6129_v1  ;;  %v3205_v47 = vsub.f32 %v3136_v42, %v3204_v45  ;;  %v5736_v42 = vpack.c.bf16 %v4538_v24, %v4535_v23  ;;  %v5162_v24 = vld [vmem:[%s6704_s5] ss:$0 sm:$0xff] }
 0x45d   : > { %5490 = vmatprep.subr.mxu1 %v6129_v1  ;;  %v4618_v26 = vsub.f32 %v6609_v18, %v4617_v22 }
 0x45e   : > { %v3206_v49 = vand.u32 4294901760, %v3205_v47 }
 0x460   : > { %v3207_v51 = vsub.f32 %v3205_v47, %v3206_v49 }
 0x462   : > { %v3208_v53 = vand.u32 4294901760, %v3207_v51 }
 0x463   : > { %5488 = vmatmul.mubr.f32.vlgmr.msra.gmra.mrb[4].mxu1 %v2281_v29 }
 0x464   : > { %5491 = vmatpush3.msra.mxu1 %v2293_v32  ;;  %5492 = vmatprep.mubr.msk.f32.mxu1 %vm6128_vm0, %v6129_v1  ;;  %v4631_v32 = vand.u32 4294901760, %v4630_v28 }
 0x465   : > { %5495 = vmatprep.subr.mxu1 %v6129_v1 }
 0x466   : > { %v4632_v36 = vsub.f32 %v4630_v28, %v4631_v32 }
 0x468   : > { %v4633_v38 = vand.u32 4294901760, %v4632_v36 }
 0x46b   : > { %5493 = vmatmul.mubr.f32.vlgmr.msra.gmra.mrb[4].mxu1 %v2282_v31  ;;  %v4624_v31 = vand.u32 4294901760, %v4623_v27 }
 0x46c   : > { %5496 = vmatpush3.msra.mxu1 %v2216_v30  ;;  %5497 = vmatprep.mubr.msk.f32.mxu1 %vm6128_vm0, %v6129_v1 }
 0x46d   : > { %5500 = vmatprep.subr.mxu1 %v6129_v1  ;;  %v4625_v35 = vsub.f32 %v4623_v27, %v4624_v31 }
 0x46f   : > { %v4626_v37 = vand.u32 4294901760, %v4625_v35 }
 0x471   : > { %v5742_v39 = vpack.c.bf16 %v4633_v38, %v4626_v37 }
 0x473   : > { %5498 = vmatmul.mubr.f32.vlgmr.msra.gmra.mrb[4].mxu1 %v2283_v33  ;;  %v5733_v33 = vpack.c.bf16 %v4532_v16, %v4529_v15 }
 0x474   : > { %5501 = vmatpush3.msra.mxu1 %v2294_v34  ;;  %5502 = vmatprep.mubr.msk.f32.mxu1 %vm6128_vm0, %v6129_v1 }
 0x475   : > { %5505 = vmatprep.subr.mxu1 %v6129_v1  ;;  %5734 = vmatpush3.bf16.msra.mxu0 %v5733_v33 }
 0x476   : > { %5735 = vmatprep.subr.bf16.mxu0 %v6127_v0 }
 0x477   : > { %v4052_v55 = vpop.xlane.xlu1 %4051 }
 0x478   : > { %5959 = vrcp.f32 %v4052_v55 }
 0x479   : > { %5737 = vmatpush3.bf16.msra.mxu0 %v5736_v42 }
 0x47a   : > { %5744 = vmatprep.subr.bf16.mxu0 %v6127_v0 }
 0x47b   : > { %5503 = vmatmul.mubr.f32.vlgmr.msra.gmra.mrb[4].mxu1 %v2281_v29 }
 0x47c   : > { %5506 = vmatpush3.msra.mxu1 %v2216_v30  ;;  %5507 = vmatprep.mubr.msk.f32.mxu1 %vm6128_vm0, %v6129_v1  ;;  %v4619_v30 = vand.u32 4294901760, %v4618_v26  ;;  %v5163_v26 = vld [vmem:[%s6705_s6] ss:$0 sm:$0xff] }
 0x47d   : > { %5540 = vmatprep.subr.mxu1 %v6129_v1 }
 0x482   : > { %v5960_v56 = vpop.eup %5959 }
 0x483   : > { %5508 = vmatmul.mubr.f32.vlgmr.msra.gmra.mrb[4].mxu1 %v2281_v29  ;;  %v4054_v57 = vmul.f32 %v5960_v56, %v6524_v8  ;;  %v4612_v29 = vand.u32 4294901760, %v4611_v25 }
 0x484   : > { %5541 = vmatpush3.msra.mxu1 %v3139_v46  ;;  %5542 = vmatprep.mubr.msk.f32.mxu1 %vm6128_vm0, %v6129_v1 }
 0x485   : > { %5545 = vmatprep.subr.mxu1 %v6129_v1  ;;  %v4059_v58 = vsel %vm828_vm2, %v4054_v57, 0  ;;  %v5739_v34 = vpack.c.bf16 %v4619_v30, %v4612_v29 }
 0x486   : > { %v4127_v60 = vand.u32 4294901760, %v4059_v58 }
 0x487   : > { %5543 = vmatmul.mubr.f32.vlgmr.msra.gmra.mrb[6].mxu1 %v3208_v53 }
 0x488   : > { %5546 = vmatpush3.msra.mxu1 %v3219_v54  ;;  %5547 = vmatprep.mubr.msk.f32.mxu1 %vm6128_vm0, %v6129_v1  ;;  %v4128_v62 = vsub.f32 %v4059_v58, %v4127_v60 }
 0x489   : > { %5550 = vmatprep.subr.mxu1 %v6129_v1 }
 0x48a   : > { %v4129_v2 = vand.u32 4294901760, %v4128_v62 }
 0x48c   : > { %v4130_v4 = vsub.f32 %v4128_v62, %v4129_v2 }
 0x48e   : > { %v4131_v6 = vand.u32 4294901760, %v4130_v4 }
 0x48f   : > { %5548 = vmatmul.mubr.f32.vlgmr.msra.gmra.mrb[6].mxu1 %v3204_v45 }
 0x490   : > { %5551 = vmatpush3.msra.mxu1 %v3216_v48  ;;  %5552 = vmatprep.mubr.msk.f32.mxu1 %vm6128_vm0, %v6129_v1 }
 0x491   : > { %5555 = vmatprep.subr.mxu1 %v6129_v1 }
 0x497   : > { %5553 = vmatmul.mubr.f32.vlgmr.msra.gmra.mrb[6].mxu1 %v3205_v47  ;;  %v5760_v47 = vpack.c.bf16 %v4631_v32, %v4624_v31 }
 0x498   : > { %5556 = vmatpush3.msra.mxu1 %v3139_v46  ;;  %5557 = vmatprep.mubr.msk.f32.mxu1 %vm6128_vm0, %v6129_v1 }
 0x499   : > { %5560 = vmatprep.subr.mxu1 %v6129_v1 }
 0x49f   : > { %5558 = vmatmul.mubr.f32.vlgmr.msra.gmra.mrb[6].mxu1 %v3206_v49 }
 0x4a0   : > { %5561 = vmatpush3.msra.mxu1 %v3217_v50  ;;  %5562 = vmatprep.mubr.msk.f32.mxu1 %vm6128_vm0, %v6129_v1 }
 0x4a1   : > { %5565 = vmatprep.subr.mxu1 %v6129_v1 }
 0x4a7   : > { %5563 = vmatmul.mubr.f32.vlgmr.msra.gmra.mrb[6].mxu1 %v3204_v45 }
 0x4a8   : > { %5566 = vmatpush3.msra.mxu1 %v3139_v46  ;;  %5567 = vmatprep.mubr.msk.f32.mxu1 %vm6128_vm0, %v6129_v1  ;;  %v5757_v46 = vpack.c.bf16 %v4617_v22, %v4610_v21 }
 0x4a9   : > { %5600 = vmatprep.subr.mxu1 %v6129_v1 }
 0x4af   : > { %5568 = vmatmul.mubr.f32.vlgmr.msra.gmra.mrb[6].mxu1 %v3204_v45  ;;  %v5748_v45 = vpack.c.bf16 %v4630_v28, %v4623_v27 }
 0x4b0   : > { %5601 = vmatpush3.msra.mxu1 %v4062_v61  ;;  %5602 = vmatprep.mubr.msk.f32.mxu1 %vm6128_vm0, %v6129_v1 }
 0x4b1   : > { %5605 = vmatprep.subr.mxu1 %v6129_v1 }
 0x4b3   : > { %5603 = vmatmul.mubr.f32.vlgmr.msra.gmra.mrb[8].mxu1 %v4131_v6 }
 0x4b4   : > { %5606 = vmatpush3.msra.mxu1 %v4142_v7  ;;  %5607 = vmatprep.mubr.msk.f32.mxu1 %vm6128_vm0, %v6129_v1 }
 0x4b5   : > { %5610 = vmatprep.subr.mxu1 %v6129_v1 }
 0x4bb   : > { %5608 = vmatmul.mubr.f32.vlgmr.msra.gmra.mrb[8].mxu1 %v4127_v60 }
 0x4bc   : > { %5611 = vmatpush3.msra.mxu1 %v4139_v63  ;;  %5612 = vmatprep.mubr.msk.f32.mxu1 %vm6128_vm0, %v6129_v1 }
 0x4bd   : > { %5615 = vmatprep.subr.mxu1 %v6129_v1 }
 0x4c3   : > { %5613 = vmatmul.mubr.f32.vlgmr.msra.gmra.mrb[8].mxu1 %v4128_v62 }
 0x4c4   : > { %5616 = vmatpush3.msra.mxu1 %v4062_v61  ;;  %5617 = vmatprep.mubr.msk.f32.mxu1 %vm6128_vm0, %v6129_v1 }
 0x4c5   : > { %5620 = vmatprep.subr.mxu1 %v6129_v1 }
 0x4cb   : > { %5618 = vmatmul.mubr.f32.vlgmr.msra.gmra.mrb[8].mxu1 %v4129_v2 }
 0x4cc   : > { %5621 = vmatpush3.msra.mxu1 %v4140_v3  ;;  %5622 = vmatprep.mubr.msk.f32.mxu1 %vm6128_vm0, %v6129_v1 }
 0x4cd   : > { %5625 = vmatprep.subr.mxu1 %v6129_v1 }
 0x4d3   : > { %5623 = vmatmul.mubr.f32.vlgmr.msra.gmra.mrb[8].mxu1 %v4127_v60 }
 0x4d4   : > { %5626 = vmatpush3.msra.mxu1 %v4062_v61  ;;  %5627 = vmatprep.mubr.msk.f32.mxu1 %vm6128_vm0, %v6129_v1 }
 0x4d5   : > { %5738 = vmatprep.subr.bf16.mxu1 %v6127_v0 }
 0x4db   : > { %5628 = vmatmul.mubr.f32.vlgmr.msra.gmra.mrb[8].mxu1 %v4127_v60  ;;  %v5161_v60 = vld [vmem:[%s6703_s4] ss:$0 sm:$0xff] }
 0x4dc   : > { %5649 = vmatprep.mubr.msk.f32.mxu1 %vm6128_vm0, %v6129_v1  ;;  %5740 = vmatpush3.bf16.msra.mxu1 %v5739_v34 }
 0x4dd   : > { %5741 = vmatprep.subr.bf16.mxu1 %v6127_v0 }
 0x4e0   : > { %5743 = vmatpush3.bf16.msra.mxu1 %v5742_v39 }
 0x4e1   : > { %5750 = vmatprep.subr.bf16.mxu1 %v6127_v0 }
 0x52a   : > { %v1739_v8 = vpop.f32.mrb[2].mxu1 }
 0x52b   : > { %1743 = vst.msk [vmem:[#allocation2] sm:$0xff] %vm828_vm2, %v1739_v8  ;;  %v5449_v9 = vpop.f32.mrb[3].mxu1 }
 0x556   : > { %v2657_v10 = vpop.f32.mrb[4].mxu1 }
 0x557   : > { %2662 = vrot.lane.b32.xlu1 %v2657_v10, %s6141_s20  ;;  %v5509_v11 = vpop.f32.mrb[5].mxu1 }
 0x582   : > { %v3580_v12 = vpop.f32.mrb[6].mxu1 }
 0x583   : > { %3585 = vrot.lane.b32.xlu0 %v3580_v12, %s6142_s11  ;;  %v5569_v13 = vpop.f32.mrb[7].mxu1 }
 0x584   : > { %v5963_v13 = vld [vmem:[%s6360_s29] sm:$0xff]  ;;  %s6056_s29 = scalar_lea.vmem %s6055_s14, 256 }
 0x585   : > { %p6058_p9 = scmp.lt.s32.totalorder %s6056_s29, %s6050_s18 }
 0x587   : > { %p6059_p12 = por %p6058_p9, %p6057_p7 }
 0x589   : > { %p6060_p2 = pnand %p6059_p12, %p6053_p3 }
 0x5ae   : > { %v4503_v40 = vpop.f32.mrb[8].mxu1 }
 0x5af   : > { %4508 = vrot.lane.b32.xlu0 %v4503_v40, %s6143_s22  ;;  %v5629_v41 = vpop.f32.mrb[9].mxu1  ;;  %s6654_s22 = scalar_lea.hbm %s6706_s7, %s5165_s23 }
 0x5c9   : > { %v2663_v48 = vpop.permute.xlu1 %2662 }
 0x5ca   : > { %2666 = vst.msk [vmem:[#allocation2] sm:$0xff] %vm2665_vm3, %v2663_v48 }
 0x5f5   : > { %v3586_v49 = vpop.permute.xlu0 %3585 }
 0x5f6   : > { %3589 = vst.msk [vmem:[#allocation2] sm:$0xff] %vm3588_vm4, %v3586_v49 }
 0x621   : > { %v4509_v50 = vpop.permute.xlu0 %4508 }
 0x622   : > { %4512 = vst.msk [vmem:[#allocation2] sm:$0xff] %vm4511_vm5, %v4509_v50 }
 0x629   : > { %v4513_v51 = vld [vmem:[#allocation2] sm:$0xff] }
 0x62a   : > { %v4526_v52 = vsel %vm335_vm1, %v4513_v51, 0 }
 0x62b   : > { %v4597_v53 = vand.u32 4294901760, %v4526_v52 }
 0x62d   : > { %v4598_v54 = vsub.f32 %v4526_v52, %v4597_v53  ;;  %5650 = vmatmul.mubr.f32.vlgmr.msra.gmra.mrb[10].mxu1 %v4597_v53 }
 0x62e   : > { %5752 = vmatpush3.bf16.msra.mxu1 %v5733_v33  ;;  %5671 = vmatprep.mubr.msk.f32.mxu1 %vm6128_vm0, %v6129_v1 }
 0x62f   : > { %5753 = vmatprep.subr.bf16.mxu1 %v6127_v0  ;;  %v4599_v55 = vand.u32 4294901760, %v4598_v54 }
 0x631   : > { %v4600_v56 = vsub.f32 %v4598_v54, %v4599_v55 }
 0x632   : > { %5755 = vmatpush3.bf16.msra.mxu1 %v5736_v42 }
 0x633   : > { %5762 = vmatprep.subr.bf16.mxu1 %v6127_v0  ;;  %v4601_v57 = vand.u32 4294901760, %v4600_v56 }
 0x635   : > { %5672 = vmatmul.mubr.f32.vlgmr.msra.gmra.mrb[12].mxu1 %v4599_v55  ;;  %5639 = vmatmul.mubr.f32.vlgmr.msra.gmra.mrb[8].mxu0 %v4601_v57 }
 0x636   : > { %5746 = vmatpush3.bf16.msra.mxu0 %v5745_v44  ;;  %5764 = vmatpush3.bf16.msra.mxu1 %v5733_v33 }
 0x637   : > { %5747 = vmatprep.subr.bf16.mxu0 %v6127_v0  ;;  %5765 = vmatprep.subr.bf16.mxu1 %v6127_v0 }
 0x638   : > { %5660 = vmatprep.mubr.msk.f32.mxu0 %vm6128_vm0, %v6129_v1  ;;  %5693 = vmatprep.mubr.msk.f32.mxu1 %vm6128_vm0, %v6129_v1 }
 0x63a   : > { %5749 = vmatpush3.bf16.msra.mxu0 %v5748_v45  ;;  %5767 = vmatpush3.bf16.msra.mxu1 %v5736_v42 }
 0x63b   : > { %5756 = vmatprep.subr.bf16.mxu0 %v6127_v0 }
 0x63d   : > { %5661 = vmatmul.mubr.f32.vlgmr.msra.gmra.mrb[10].mxu0 %v4598_v54  ;;  %5694 = vmatmul.mubr.f32.vlgmr.msra.gmra.mrb[14].mxu1 %v4597_v53 }
 0x63e   : > { %5758 = vmatpush3.bf16.msra.mxu0 %v5757_v46  ;;  %5682 = vmatprep.mubr.msk.f32.mxu0 %vm6128_vm0, %v6129_v1 }
 0x63f   : > { %5759 = vmatprep.subr.bf16.mxu0 %v6127_v0 }
 0x642   : > { %5761 = vmatpush3.bf16.msra.mxu0 %v5760_v47 }
 0x645   : > { %5683 = vmatmul.mubr.f32.vlgmr.msra.gmra.mrb[12].mxu0 %v4597_v53 }
 0x700   : > { %v4694_v58 = vpop.f32.mrb[10].mxu1 }
 0x701   : > { %v5651_v59 = vpop.f32.mrb[11].mxu1 }
 0x708   : > { %v4851_v61 = vpop.f32.mrb[12].mxu1  ;;  %v4603_v62 = vpop.f32.mrb[8].mxu0 }
 0x709   : > { %v4604_v63 = vadd.f32 %v5161_v60, %v4603_v62  ;;  %v5673_v2 = vpop.f32.mrb[13].mxu1  ;;  %v5640_v3 = vpop.f32.mrb[9].mxu0 }
 0x70b   : > { %v4695_v4 = vadd.f32 %v4694_v58, %v4604_v63 }
 0x710   : > { %v4774_v5 = vpop.f32.mrb[10].mxu0  ;;  %v5009_v6 = vpop.f32.mrb[14].mxu1 }
 0x711   : > { %v4775_v1 = vadd.f32 %v4774_v5, %v4695_v4  ;;  %v5662_v7 = vpop.f32.mrb[11].mxu0  ;;  %v5695_v0 = vpop.f32.mrb[15].mxu1 }
 0x713   : > { %v4852_v8 = vadd.f32 %v4851_v61, %v4775_v1 }
 0x718   : > { %v4934_v9 = vpop.f32.mrb[12].mxu0 }
 0x719   : > { %v4935_v10 = vadd.f32 %v4934_v9, %v4852_v8  ;;  %v5684_v11 = vpop.f32.mrb[13].mxu0 }
 0x71b   : > { %v5010_v12 = vadd.f32 %v5009_v6, %v4935_v10 }
 0x71d   : > { %v5013_v14 = vadd.f32 %v5963_v13, %v5010_v12 }
 0x71f   : > { %v5014_v43 = vsel %vm335_vm1, %v5013_v14, 0.0 }
 0x720   : > { %5015 = vadd.xlane.f32.xlu0 %v5014_v43 }
 0x7ad   : > { %v5016_v15 = vpop.xlane.xlu0 %5015 }
 0x7ae   : > { %v5018_v16 = vmul.f32 0.03125, %v5016_v15 }
 0x7b0   : > { %v5019_v17 = vsub.f32 %v5013_v14, %v5018_v16 }
 0x7b2   : > { %v5020_v18 = vmul.f32 %v5019_v17, %v5019_v17 }
 0x7b4   : > { %v5021_v19 = vsel %vm335_vm1, %v5020_v18, 0.0 }
 0x7b5   : > { %5022 = vadd.xlane.f32.xlu1 %v5021_v19 }
 0x842   : > { %v5023_v20 = vpop.xlane.xlu1 %5022 }
 0x843   : > { %v5024_v21 = vmul.f32 0.03125, %v5023_v20 }
 0x845   : > { %v5025_v22 = vadd.f32 1e-05, %v5024_v21 }
 0x847   : > { %5961 = vrsqrt.f32 %v5025_v22 }
 0x851   : > { %v5962_v23 = vpop.eup %5961 }
 0x852   : > { %v5027_v25 = vmul.f32 %v5962_v23, %v5019_v17 }
 0x854   : > { %v5035_v27 = vmul.f32 %v5162_v24, %v5027_v25 }
 0x856   : > { %v5043_v28 = vadd.f32 %v5163_v26, %v5035_v27 }
 0x858   : > { %5044 = vst.msk [vmem:[%s322_s30] sm:$0xff] %vm335_vm1, %v5043_v28 }
 0x859   : > { %6063 = shalt.err (!%p6060_p2)
}
 0x85a   : > { %s6064_s12 = scalar_lea.hbm %s6654_s22, 128  ;;  %s6068_s19 = scalar_lea.hbm %s6706_s7, 256 }
 0x85b   : > { %p6065_p13 = scmp.ne.s32.totalorder %s6654_s22, %s6064_s12  ;;  %p6069_p4 = scmp.lt.u32.totalorder %s6654_s22, %s6706_s7 }
 0x85c   : > { %p6070_p5 = scmp.lt.u32.totalorder %s6068_s19, %s6064_s12  ;;  %p6072_p11 = scmp.lt.u32.totalorder %s6064_s12, %s6654_s22 }
 0x85d   : > { %p6066_p6 = pnand %p6065_p13, %p6720_p0 }
 0x85e   : > { %p6071_p8 = por %p6070_p5, %p6069_p4 }
 0x85f   : > { %p6067_p10 = pneg %p6066_p6 }
 0x860   : > { %p6073_p1 = por %p6072_p11, %p6071_p8 }
 0x862   : > { %p6074_p3 = pnand %p6073_p1, %p6067_p10 }
 0x864   : > { %6077 = shalt.err (!%p6074_p3)
}
 0x865   : > { %5869 = dma.vmem_to_hbm [thread:$0]  (%p6720_p0), %s6656_s9, 128, %s6654_s22, %s5046_s10  }
 0x866 PF: > { %s5071_s20 = sand.u32 1, %s6108_s24   ;;  %p6721_p7 = scmp.ne.s32.totalorder %s6711_s8, 0 }
 0x867   : > { %p6722_p9 = scmp.ge.s32.totalorder %s6120_s27, 2  ;;  %s5072_s11 = scalar_lea.sflag [#allocation5], %s5071_s20 }
 0x869   : > { %p5883_p12 = pnand %p6722_p9, %p6721_p7 }
 0x86b   : > { %6103 = dma.done.wait (!%p5883_p12), %s5072_s11, 128  }
 0x86c   : > { %6105 = vsyncadd (!%p5883_p12), %s5072_s11, 4294967168  ;;  %p21_p2 = scmp.ge.s32.totalorder %s6295_s13, 4   ;;  %s6723_s24 = smov %s6112_s25 }
 0x86d   : > { %s6724_s25 = smov %s6116_s26  ;;  %s6725_s26 = smov %s6311_s17 }
 0x86e   : > { %s6726_s27 = smov %s6295_s13  ;;  %23 = sbr.rel (!%p21_p2) target bundleno = 6 (0x6), region = 101 }
 0x875   :  { %5077 = vsyncpa [#allocation4], 1 }
 0x876   :  { %5079 = vsyncpa [#allocation4 + $0x1], 1 }
 0x877   :  { %5080 = vsyncpa [#allocation7], 1 }
 0x878   :  { %5081 = vsyncpa [#allocation5], 1 }
 0x879   :  { %5083 = vsyncpa [#allocation5 + $0x1], 1 }

</bundles_post_ra>
